<compile_context>
chip_gen: v7x
topology: tpu7x:2x2x1
jax: 0.10.0
libtpu: 0.0.40
codegen_flags: <defaults>
</compile_context>

<pallas_src>
import functools

import jax
import jax.numpy as jnp
import numpy as np
from jax import lax
from jax.experimental import pallas as pl
from jax.experimental.pallas import tpu as pltpu


def _mha_kernel(q_ref, k_ref, v_ref, mask_ref,
                wq_ref, wk_ref, wv_ref,
                ln_g_ref, ln_b_ref,
                fc_ref, fc_b_ref, qfc_ref, qfc_b_ref,
                out_ref, attn_ref):
    """One grid step = (batch b, q-tile t, head h)."""
    h = pl.program_id(2)

    q = q_ref[0]              # (tq, d_model)  f32 residual / pre-LN input
    mask = mask_ref[0]        # (tq, len_k)    int32, nonzero == masked out

    # --- LayerNorm over d_model (eps = 1e-5, PyTorch default), f32 VPU math ---
    mu = jnp.mean(q, axis=-1, keepdims=True)
    var = jnp.mean(jnp.square(q - mu), axis=-1, keepdims=True)
    q_ln = (q - mu) * lax.rsqrt(var + 1e-5)
    q_ln = q_ln * ln_g_ref[...] + ln_b_ref[...]

    # --- bf16 inputs for the MXU (f32 accumulation everywhere) ---
    q_ln_b = q_ln.astype(jnp.bfloat16)
    k_b = k_ref[0].astype(jnp.bfloat16)          # (len_k, d_model)
    v_b = v_ref[0].astype(jnp.bfloat16)

    # Per-head projections; weights arrive pre-transposed (d_model, d_k/d_v) with
    # 1/sqrt(d_k) already folded into wq — no in-kernel transpose, no lane slicing.
    Qh = jnp.dot(q_ln_b, wq_ref[0],
                 preferred_element_type=jnp.float32).astype(jnp.bfloat16)  # (tq, d_k)
    Kh = jnp.dot(k_b, wk_ref[0],
                 preferred_element_type=jnp.float32).astype(jnp.bfloat16)  # (lk, d_k)
    Vh = jnp.dot(v_b, wv_ref[0],
                 preferred_element_type=jnp.float32).astype(jnp.bfloat16)  # (lk, d_v)

    # Scores: contract on d_k directly so K^T never materializes.
    s = lax.dot_general(Qh, Kh, (((1,), (1,)), ((), ())),
                        preferred_element_type=jnp.float32)                # (tq, lk)
    # Large finite negative instead of -inf: identical result when a row has at
    # least one unmasked key, and avoids NaN for fully-masked rows.
    s = jnp.where(mask != 0, -1e30, s)

    # --- softmax over len_k (f32), reciprocal on the EUP slot ---
    s_max = jnp.max(s, axis=-1, keepdims=True)
    e = jnp.exp(s - s_max)
    p = e * pl.reciprocal(jnp.sum(e, axis=-1, keepdims=True), approx=True)
    attn_ref[0, 0] = p

    # Context and this head's slice of the fc projection (accumulated into out).
    ctx = jnp.dot(p.astype(jnp.bfloat16), Vh,
                  preferred_element_type=jnp.float32)                      # (tq, d_v)
    partial = jnp.dot(ctx.astype(jnp.bfloat16), fc_ref[0],
                      preferred_element_type=jnp.float32)                  # (tq, h_dv)

    @pl.when(h == 0)
    def _():
        # Epilogue terms computed once per (b, q-tile): fc bias + qfc(residual) + bias.
        resid = jnp.dot(q.astype(jnp.bfloat16), qfc_ref[...],
                        preferred_element_type=jnp.float32)                # (tq, h_dv)
        out_ref[0] = partial + resid + fc_b_ref[...] + qfc_b_ref[...]

    @pl.when(h > 0)
    def _():
        out_ref[0] += partial                                              # accumulate


def multi_head_attention(q, k, v, mask, params, *, n_head, d_k, d_v,
                         q_tile=None, mxu_dtype=jnp.bfloat16):
    sz_b, len_q, d_model = q.shape
    _, len_k, _ = k.shape
    h_dk, h_dv = n_head * d_k, n_head * d_v

    # ---- one-time, wrapper-side weight prep (pre-transpose, head-major, bf16) ----
    inv_temp = 1.0 / (d_k ** 0.5)

    def head_major_t(w, dh):                     # (n_head*dh, d_model) -> (H, d_model, dh)
        return jnp.transpose(w.T.reshape(d_model, n_head, dh), (1, 0, 2))

    wq_t = (head_major_t(params["w_qs"], d_k) * inv_temp).astype(mxu_dtype)
    wk_t = head_major_t(params["w_ks"], d_k).astype(mxu_dtype)
    wv_t = head_major_t(params["w_vs"], d_v).astype(mxu_dtype)
    fc_t = params["fc_w"].T.reshape(n_head, d_v, h_dv).astype(mxu_dtype)   # per-head rows
    qfc_t = params["qfc_w"].T.astype(mxu_dtype)                            # (d_model, h_dv)
    ln_g = params["ln_g"].astype(jnp.float32)
    ln_b = params["ln_b"].astype(jnp.float32)
    fc_b = params["fc_b"].astype(jnp.float32)
    qfc_b = params["qfc_b"].astype(jnp.float32)

    # ---- q-tile selection (bounds VMEM independent of len_q) ----
    if q_tile is None:
        q_tile = len_q
        for cand in (512, 256, 128):
            if len_q % cand == 0:
                q_tile = cand
                break
    assert len_q % q_tile == 0, "len_q must be divisible by q_tile"
    n_qt = len_q // q_tile

    out, attn = pl.pallas_call(
        _mha_kernel,
        grid=(sz_b, n_qt, n_head),
        in_specs=[
            pl.BlockSpec((1, q_tile, d_model), lambda b, t, h: (b, t, 0)),   # q
            pl.BlockSpec((1, len_k, d_model), lambda b, t, h: (b, 0, 0)),    # k
            pl.BlockSpec((1, len_k, d_model), lambda b, t, h: (b, 0, 0)),    # v
            pl.BlockSpec((1, q_tile, len_k), lambda b, t, h: (b, t, 0)),     # mask
            pl.BlockSpec((1, d_model, d_k), lambda b, t, h: (h, 0, 0)),      # w_qs^T (scaled)
            pl.BlockSpec((1, d_model, d_k), lambda b, t, h: (h, 0, 0)),      # w_ks^T
            pl.BlockSpec((1, d_model, d_v), lambda b, t, h: (h, 0, 0)),      # w_vs^T
            pl.BlockSpec((1, d_model), lambda b, t, h: (0, 0)),              # ln gamma
            pl.BlockSpec((1, d_model), lambda b, t, h: (0, 0)),              # ln beta
            pl.BlockSpec((1, d_v, h_dv), lambda b, t, h: (h, 0, 0)),         # fc_w^T (per head)
            pl.BlockSpec((1, h_dv), lambda b, t, h: (0, 0)),                 # fc bias
            pl.BlockSpec((d_model, h_dv), lambda b, t, h: (0, 0)),           # qfc_w^T
            pl.BlockSpec((1, h_dv), lambda b, t, h: (0, 0)),                 # qfc bias
        ],
        out_specs=[
            # accumulated across the head axis (same block index for all h)
            pl.BlockSpec((1, q_tile, h_dv), lambda b, t, h: (b, t, 0)),
            # per-head attention block (n_head x smaller VMEM than a fused block)
            pl.BlockSpec((1, 1, q_tile, len_k), lambda b, t, h: (h, b, t, 0)),
        ],
        out_shape=[
            jax.ShapeDtypeStruct((sz_b, len_q, h_dv), jnp.float32),
            jax.ShapeDtypeStruct((n_head, sz_b, len_q, len_k), jnp.float32),
        ],
        compiler_params=pltpu.CompilerParams(
            dimension_semantics=("parallel", "parallel", "arbitrary"),
            vmem_limit_bytes=64 * 1024 * 1024),
    )(q, k, v, mask,
      wq_t, wk_t, wv_t, ln_g, ln_b, fc_t, fc_b, qfc_t, qfc_b)

    # head-major flatten, matching torch's view(-1, len_q, len_k)
    attn = attn.reshape(n_head * sz_b, len_q, len_k)
    return out, attn


def reference(q, k, v, mask_bool, params, *, n_head, d_k, d_v):
    """Pure-JAX (f32) mirror of the PyTorch module (dropout = identity)."""
    sz_b, len_q, d_model = q.shape
    _, len_k, _ = k.shape
    residual = q
    mu = q.mean(-1, keepdims=True)
    var = jnp.square(q - mu).mean(-1, keepdims=True)
    qn = (q - mu) / jnp.sqrt(var + 1e-5) * params["ln_g"][0] + params["ln_b"][0]

    Q = qn @ params["w_qs"].T
    K = k @ params["w_ks"].T
    V = v @ params["w_vs"].T
    Q = Q.reshape(sz_b, len_q, n_head, d_k).transpose(2, 0, 1, 3).reshape(-1, len_q, d_k)
    K = K.reshape(sz_b, len_k, n_head, d_k).transpose(2, 0, 1, 3).reshape(-1, len_k, d_k)
    V = V.reshape(sz_b, len_k, n_head, d_v).transpose(2, 0, 1, 3).reshape(-1, len_k, d_v)

    m = jnp.tile(mask_bool, (n_head, 1, 1))
    s = jnp.einsum("bqd,bkd->bqk", Q, K) / (d_k ** 0.5)
    s = jnp.where(m, -jnp.inf, s)
    p = jax.nn.softmax(s, axis=2)
    ctx = jnp.einsum("bqk,bkd->bqd", p, V)

    ctx = ctx.reshape(n_head, sz_b, len_q, d_v).transpose(1, 2, 0, 3).reshape(sz_b, len_q, -1)
    out = ctx @ params["fc_w"].T + params["fc_b"][0]
    out = out + residual @ params["qfc_w"].T + params["qfc_b"][0]
    return out, p


def xavier_normal(key, shape):
    fan_out, fan_in = shape
    std = (2.0 / (fan_in + fan_out)) ** 0.5
    return std * jax.random.normal(key, shape, dtype=jnp.float32)


if __name__ == "__main__":
    # small, forward-consistent shapes
    d_model, n_head, d_k, d_v = 32, 2, 16, 16
    sz_b, seq = 2, 8
    h_dk, h_dv = n_head * d_k, n_head * d_v

    key = jax.random.PRNGKey(0)
    keys = jax.random.split(key, 12)

    params = {
        "w_qs": xavier_normal(keys[0], (h_dk, d_model)),
        "w_ks": xavier_normal(keys[1], (h_dk, d_model)),
        "w_vs": xavier_normal(keys[2], (h_dv, d_model)),
        "ln_g": jnp.ones((1, d_model), jnp.float32),
        "ln_b": jnp.zeros((1, d_model), jnp.float32),
        "fc_w": xavier_normal(keys[3], (h_dv, h_dv)),
        "fc_b": 0.1 * jax.random.normal(keys[4], (1, h_dv), dtype=jnp.float32),
        "qfc_w": xavier_normal(keys[5], (h_dv, d_model)),
        "qfc_b": 0.1 * jax.random.normal(keys[6], (1, h_dv), dtype=jnp.float32),
    }

    q = jax.random.normal(keys[7], (sz_b, seq, d_model), dtype=jnp.float32)
    k = jax.random.normal(keys[8], (sz_b, seq, d_model), dtype=jnp.float32)
    v = jax.random.normal(keys[9], (sz_b, seq, d_model), dtype=jnp.float32)

    # causal mask: True => masked (filled with -inf in the reference), no fully-masked rows
    row = jnp.arange(seq)[:, None]
    col = jnp.arange(seq)[None, :]
    mask_bool = jnp.broadcast_to(col > row, (sz_b, seq, seq))
    mask_i32 = mask_bool.astype(jnp.int32)

    out, attn = multi_head_attention(q, k, v, mask_i32, params,
                                     n_head=n_head, d_k=d_k, d_v=d_v)
    out = jax.block_until_ready(out)
    attn = jax.block_until_ready(attn)

    out_ref, attn_ref = reference(q, k, v, mask_bool, params,
                                  n_head=n_head, d_k=d_k, d_v=d_v)

    # Kernel feeds bf16 into the MXU (f32 accumulation); reference is pure f32,
    # so tolerances are set for bf16-vs-f32 comparison.
    np.testing.assert_allclose(np.asarray(attn), np.asarray(attn_ref),
                               rtol=2e-2, atol=2e-2)
    np.testing.assert_allclose(np.asarray(out), np.asarray(out_ref),
                               rtol=5e-2, atol=5e-2)
    assert out.shape == (sz_b, seq, h_dv)
    assert attn.shape == (n_head * sz_b, seq, seq)

    print("KERNEL_OK")
</pallas_src>

<mosaic_0001>
module attributes {stable_mosaic.version = 11 : i64} {
  func.func @_mha_kernel(%arg0: i32, %arg1: i32, %arg2: i32, %arg3: memref<1x8x32xf32, #tpu.memory_space<vmem>>, %arg4: memref<1x8x32xf32, #tpu.memory_space<vmem>>, %arg5: memref<1x8x32xf32, #tpu.memory_space<vmem>>, %arg6: memref<1x8x8xi32, #tpu.memory_space<vmem>>, %arg7: memref<1x32x16xbf16, #tpu.memory_space<vmem>>, %arg8: memref<1x32x16xbf16, #tpu.memory_space<vmem>>, %arg9: memref<1x32x16xbf16, #tpu.memory_space<vmem>>, %arg10: memref<1x32xf32, #tpu.memory_space<vmem>>, %arg11: memref<1x32xf32, #tpu.memory_space<vmem>>, %arg12: memref<1x16x32xbf16, #tpu.memory_space<vmem>>, %arg13: memref<1x32xf32, #tpu.memory_space<vmem>>, %arg14: memref<32x32xbf16, #tpu.memory_space<vmem>>, %arg15: memref<1x32xf32, #tpu.memory_space<vmem>>, %arg16: memref<1x8x32xf32, #tpu.memory_space<vmem>>, %arg17: memref<1x1x8x8xf32, #tpu.memory_space<vmem>>) attributes {dimension_semantics = [#tpu.dimension_semantics<parallel>, #tpu.dimension_semantics<parallel>, #tpu.dimension_semantics<arbitrary>], iteration_bounds = array<i64: 2, 1, 2>, scalar_prefetch = 0 : i64, scratch_operands = 0 : i64, tpu.core_type = #tpu.core_type<tc>, window_params = [{transform_indices = @transform_0, window_bounds = array<i64: 1, 8, 32>}, {transform_indices = @transform_1, window_bounds = array<i64: 1, 8, 32>}, {transform_indices = @transform_2, window_bounds = array<i64: 1, 8, 32>}, {transform_indices = @transform_3, window_bounds = array<i64: 1, 8, 8>}, {transform_indices = @transform_4, window_bounds = array<i64: 1, 32, 16>}, {transform_indices = @transform_5, window_bounds = array<i64: 1, 32, 16>}, {transform_indices = @transform_6, window_bounds = array<i64: 1, 32, 16>}, {pipeline_mode = #tpu.pipeline_mode<synchronous>, transform_indices = @transform_7, window_bounds = array<i64: 1, 32>}, {pipeline_mode = #tpu.pipeline_mode<synchronous>, transform_indices = @transform_8, window_bounds = array<i64: 1, 32>}, {transform_indices = @transform_9, window_bounds = array<i64: 1, 16, 32>}, {pipeline_mode = #tpu.pipeline_mode<synchronous>, transform_indices = @transform_10, window_bounds = array<i64: 1, 32>}, {pipeline_mode = #tpu.pipeline_mode<synchronous>, transform_indices = @transform_11, window_bounds = array<i64: 32, 32>}, {pipeline_mode = #tpu.pipeline_mode<synchronous>, transform_indices = @transform_12, window_bounds = array<i64: 1, 32>}, {transform_indices = @transform_13, window_bounds = array<i64: 1, 8, 32>}, {transform_indices = @transform_14, window_bounds = array<i64: 1, 1, 8, 8>}]} {
    %c0 = arith.constant 0 : index
    %c0_0 = arith.constant 0 : index
    %c0_1 = arith.constant 0 : index
    %0 = vector.load %arg3[%c0, %c0_0, %c0_1] : memref<1x8x32xf32, #tpu.memory_space<vmem>>, vector<1x8x32xf32>
    %1 = vector.shape_cast %0 : vector<1x8x32xf32> to vector<8x32xf32>
    %c0_2 = arith.constant 0 : index
    %c0_3 = arith.constant 0 : index
    %c0_4 = arith.constant 0 : index
    %2 = vector.load %arg6[%c0_2, %c0_3, %c0_4] : memref<1x8x8xi32, #tpu.memory_space<vmem>>, vector<1x8x8xi32>
    %3 = vector.shape_cast %2 : vector<1x8x8xi32> to vector<8x8xi32>
    %cst = arith.constant dense<0.000000e+00> : vector<8xf32>
    %4 = vector.multi_reduction <add>, %1, %cst [1] : vector<8x32xf32> to vector<8xf32>
    %5 = vector.shape_cast %4 : vector<8xf32> to vector<8x1xf32>
    %cst_5 = arith.constant 3.200000e+01 : f32
    %6 = vector.broadcast %cst_5 : f32 to vector<8x1xf32>
    %7 = arith.divf %5, %6 : vector<8x1xf32>
    %8 = vector.broadcast %7 : vector<8x1xf32> to vector<8x32xf32>
    %9 = arith.subf %1, %8 : vector<8x32xf32>
    %10 = arith.mulf %9, %9 : vector<8x32xf32>
    %cst_6 = arith.constant dense<0.000000e+00> : vector<8xf32>
    %11 = vector.multi_reduction <add>, %10, %cst_6 [1] : vector<8x32xf32> to vector<8xf32>
    %12 = vector.shape_cast %11 : vector<8xf32> to vector<8x1xf32>
    %cst_7 = arith.constant 3.200000e+01 : f32
    %13 = vector.broadcast %cst_7 : f32 to vector<8x1xf32>
    %14 = arith.divf %12, %13 : vector<8x1xf32>
    %15 = vector.broadcast %7 : vector<8x1xf32> to vector<8x32xf32>
    %16 = arith.subf %1, %15 : vector<8x32xf32>
    %cst_8 = arith.constant 9.99999974E-6 : f32
    %17 = vector.broadcast %cst_8 : f32 to vector<8x1xf32>
    %18 = arith.addf %14, %17 : vector<8x1xf32>
    %19 = math.rsqrt %18 : vector<8x1xf32>
    %20 = vector.broadcast %19 : vector<8x1xf32> to vector<8x32xf32>
    %21 = arith.mulf %16, %20 : vector<8x32xf32>
    %c0_9 = arith.constant 0 : index
    %c0_10 = arith.constant 0 : index
    %22 = vector.load %arg10[%c0_9, %c0_10] : memref<1x32xf32, #tpu.memory_space<vmem>>, vector<1x32xf32>
    %23 = vector.broadcast %22 : vector<1x32xf32> to vector<8x32xf32>
    %24 = arith.mulf %21, %23 : vector<8x32xf32>
    %c0_11 = arith.constant 0 : index
    %c0_12 = arith.constant 0 : index
    %25 = vector.load %arg11[%c0_11, %c0_12] : memref<1x32xf32, #tpu.memory_space<vmem>>, vector<1x32xf32>
    %26 = vector.broadcast %25 : vector<1x32xf32> to vector<8x32xf32>
    %27 = arith.addf %24, %26 : vector<8x32xf32>
    %28 = arith.truncf %27 : vector<8x32xf32> to vector<8x32xbf16>
    %c0_13 = arith.constant 0 : index
    %c0_14 = arith.constant 0 : index
    %c0_15 = arith.constant 0 : index
    %29 = vector.load %arg4[%c0_13, %c0_14, %c0_15] : memref<1x8x32xf32, #tpu.memory_space<vmem>>, vector<1x8x32xf32>
    %30 = vector.shape_cast %29 : vector<1x8x32xf32> to vector<8x32xf32>
    %31 = arith.truncf %30 : vector<8x32xf32> to vector<8x32xbf16>
    %c0_16 = arith.constant 0 : index
    %c0_17 = arith.constant 0 : index
    %c0_18 = arith.constant 0 : index
    %32 = vector.load %arg5[%c0_16, %c0_17, %c0_18] : memref<1x8x32xf32, #tpu.memory_space<vmem>>, vector<1x8x32xf32>
    %33 = vector.shape_cast %32 : vector<1x8x32xf32> to vector<8x32xf32>
    %34 = arith.truncf %33 : vector<8x32xf32> to vector<8x32xbf16>
    %c0_19 = arith.constant 0 : index
    %c0_20 = arith.constant 0 : index
    %c0_21 = arith.constant 0 : index
    %35 = vector.load %arg7[%c0_19, %c0_20, %c0_21] : memref<1x32x16xbf16, #tpu.memory_space<vmem>>, vector<1x32x16xbf16>
    %36 = vector.shape_cast %35 : vector<1x32x16xbf16> to vector<32x16xbf16>
    %cst_22 = arith.constant dense<0.000000e+00> : vector<8x16xf32>
    %37 = tpu.matmul %28, %36, %cst_22 {dimension_numbers = #tpu.dot_dimension_numbers<[1], [0], [0], [1], [0, 0, 1, 1], [], []>} : vector<8x32xbf16>, vector<32x16xbf16>, vector<8x16xf32> -> vector<8x16xf32>
    %38 = arith.truncf %37 : vector<8x16xf32> to vector<8x16xbf16>
    %c0_23 = arith.constant 0 : index
    %c0_24 = arith.constant 0 : index
    %c0_25 = arith.constant 0 : index
    %39 = vector.load %arg8[%c0_23, %c0_24, %c0_25] : memref<1x32x16xbf16, #tpu.memory_space<vmem>>, vector<1x32x16xbf16>
    %40 = vector.shape_cast %39 : vector<1x32x16xbf16> to vector<32x16xbf16>
    %cst_26 = arith.constant dense<0.000000e+00> : vector<8x16xf32>
    %41 = tpu.matmul %31, %40, %cst_26 {dimension_numbers = #tpu.dot_dimension_numbers<[1], [0], [0], [1], [0, 0, 1, 1], [], []>} : vector<8x32xbf16>, vector<32x16xbf16>, vector<8x16xf32> -> vector<8x16xf32>
    %42 = arith.truncf %41 : vector<8x16xf32> to vector<8x16xbf16>
    %c0_27 = arith.constant 0 : index
    %c0_28 = arith.constant 0 : index
    %c0_29 = arith.constant 0 : index
    %43 = vector.load %arg9[%c0_27, %c0_28, %c0_29] : memref<1x32x16xbf16, #tpu.memory_space<vmem>>, vector<1x32x16xbf16>
    %44 = vector.shape_cast %43 : vector<1x32x16xbf16> to vector<32x16xbf16>
    %cst_30 = arith.constant dense<0.000000e+00> : vector<8x16xf32>
    %45 = tpu.matmul %34, %44, %cst_30 {dimension_numbers = #tpu.dot_dimension_numbers<[1], [0], [0], [1], [0, 0, 1, 1], [], []>} : vector<8x32xbf16>, vector<32x16xbf16>, vector<8x16xf32> -> vector<8x16xf32>
    %46 = arith.truncf %45 : vector<8x16xf32> to vector<8x16xbf16>
    %cst_31 = arith.constant dense<0.000000e+00> : vector<8x8xf32>
    %47 = tpu.matmul %38, %42, %cst_31 {dimension_numbers = #tpu.dot_dimension_numbers<[1], [1], [0], [0], [0, 0, 1, 0], [], []>} : vector<8x16xbf16>, vector<8x16xbf16>, vector<8x8xf32> -> vector<8x8xf32>
    %c0_i32 = arith.constant 0 : i32
    %48 = vector.broadcast %c0_i32 : i32 to vector<8x8xi32>
    %49 = arith.cmpi ne, %3, %48 : vector<8x8xi32>
    %cst_32 = arith.constant -1.000000e+30 : f32
    %50 = vector.broadcast %cst_32 : f32 to vector<8x8xf32>
    %51 = arith.select %49, %50, %47 : vector<8x8xi1>, vector<8x8xf32>
    %cst_33 = arith.constant dense<0xFF800000> : vector<8xf32>
    %52 = vector.multi_reduction <maximumf>, %51, %cst_33 [1] : vector<8x8xf32> to vector<8xf32>
    %53 = vector.shape_cast %52 : vector<8xf32> to vector<8x1xf32>
    %54 = vector.broadcast %53 : vector<8x1xf32> to vector<8x8xf32>
    %55 = arith.subf %51, %54 : vector<8x8xf32>
    %56 = math.exp %55 : vector<8x8xf32>
    %cst_34 = arith.constant dense<0.000000e+00> : vector<8xf32>
    %57 = vector.multi_reduction <add>, %56, %cst_34 [1] : vector<8x8xf32> to vector<8xf32>
    %58 = vector.shape_cast %57 : vector<8xf32> to vector<8x1xf32>
    %59 = tpu.reciprocal %58 {approx = true} : vector<8x1xf32> -> vector<8x1xf32>
    %60 = vector.broadcast %59 : vector<8x1xf32> to vector<8x8xf32>
    %61 = arith.mulf %56, %60 : vector<8x8xf32>
    %c0_35 = arith.constant 0 : index
    %c0_36 = arith.constant 0 : index
    %c0_37 = arith.constant 0 : index
    %c0_38 = arith.constant 0 : index
    %62 = vector.load %arg17[%c0_35, %c0_36, %c0_37, %c0_38] : memref<1x1x8x8xf32, #tpu.memory_space<vmem>>, vector<1x1x8x8xf32>
    %63 = vector.shape_cast %62 : vector<1x1x8x8xf32> to vector<8x8xf32>
    %64 = vector.shape_cast %61 : vector<8x8xf32> to vector<1x1x8x8xf32>
    tpu.vector_store %arg17[%c0_35, %c0_36, %c0_37, %c0_38], %64 {strides = array<i32>} : memref<1x1x8x8xf32, #tpu.memory_space<vmem>>, vector<1x1x8x8xf32>,
    %65 = arith.truncf %61 : vector<8x8xf32> to vector<8x8xbf16>
    %cst_39 = arith.constant dense<0.000000e+00> : vector<8x16xf32>
    %66 = tpu.matmul %65, %46, %cst_39 {dimension_numbers = #tpu.dot_dimension_numbers<[1], [0], [0], [1], [0, 0, 1, 1], [], []>} : vector<8x8xbf16>, vector<8x16xbf16>, vector<8x16xf32> -> vector<8x16xf32>
    %67 = arith.truncf %66 : vector<8x16xf32> to vector<8x16xbf16>
    %c0_40 = arith.constant 0 : index
    %c0_41 = arith.constant 0 : index
    %c0_42 = arith.constant 0 : index
    %68 = vector.load %arg12[%c0_40, %c0_41, %c0_42] : memref<1x16x32xbf16, #tpu.memory_space<vmem>>, vector<1x16x32xbf16>
    %69 = vector.shape_cast %68 : vector<1x16x32xbf16> to vector<16x32xbf16>
    %cst_43 = arith.constant dense<0.000000e+00> : vector<8x32xf32>
    %70 = tpu.matmul %67, %69, %cst_43 {dimension_numbers = #tpu.dot_dimension_numbers<[1], [0], [0], [1], [0, 0, 1, 1], [], []>} : vector<8x16xbf16>, vector<16x32xbf16>, vector<8x32xf32> -> vector<8x32xf32>
    %c0_i32_44 = arith.constant 0 : i32
    %71 = arith.cmpi eq, %arg2, %c0_i32_44 : i32
    %72 = arith.extui %71 : i1 to i32
    %c0_i32_45 = arith.constant 0 : i32
    %73 = arith.cmpi ne, %72, %c0_i32_45 : i32
    scf.if %73 {
      %77 = arith.truncf %1 : vector<8x32xf32> to vector<8x32xbf16>
      %c0_48 = arith.constant 0 : index
      %c0_49 = arith.constant 0 : index
      %78 = vector.load %arg14[%c0_48, %c0_49] : memref<32x32xbf16, #tpu.memory_space<vmem>>, vector<32x32xbf16>
      %cst_50 = arith.constant dense<0.000000e+00> : vector<8x32xf32>
      %79 = tpu.matmul %77, %78, %cst_50 {dimension_numbers = #tpu.dot_dimension_numbers<[1], [0], [0], [1], [0, 0, 1, 1], [], []>} : vector<8x32xbf16>, vector<32x32xbf16>, vector<8x32xf32> -> vector<8x32xf32>
      %80 = arith.addf %70, %79 : vector<8x32xf32>
      %c0_51 = arith.constant 0 : index
      %c0_52 = arith.constant 0 : index
      %81 = vector.load %arg13[%c0_51, %c0_52] : memref<1x32xf32, #tpu.memory_space<vmem>>, vector<1x32xf32>
      %82 = vector.broadcast %81 : vector<1x32xf32> to vector<8x32xf32>
      %83 = arith.addf %80, %82 : vector<8x32xf32>
      %c0_53 = arith.constant 0 : index
      %c0_54 = arith.constant 0 : index
      %84 = vector.load %arg15[%c0_53, %c0_54] : memref<1x32xf32, #tpu.memory_space<vmem>>, vector<1x32xf32>
      %85 = vector.broadcast %84 : vector<1x32xf32> to vector<8x32xf32>
      %86 = arith.addf %83, %85 : vector<8x32xf32>
      %c0_55 = arith.constant 0 : index
      %c0_56 = arith.constant 0 : index
      %c0_57 = arith.constant 0 : index
      %87 = vector.load %arg16[%c0_55, %c0_56, %c0_57] : memref<1x8x32xf32, #tpu.memory_space<vmem>>, vector<1x8x32xf32>
      %88 = vector.shape_cast %87 : vector<1x8x32xf32> to vector<8x32xf32>
      %89 = vector.shape_cast %86 : vector<8x32xf32> to vector<1x8x32xf32>
      tpu.vector_store %arg16[%c0_55, %c0_56, %c0_57], %89 {strides = array<i32>} : memref<1x8x32xf32, #tpu.memory_space<vmem>>, vector<1x8x32xf32>,
    } else {
    }
    %c0_i32_46 = arith.constant 0 : i32
    %74 = arith.cmpi sgt, %arg2, %c0_i32_46 : i32
    %75 = arith.extui %74 : i1 to i32
    %c0_i32_47 = arith.constant 0 : i32
    %76 = arith.cmpi ne, %75, %c0_i32_47 : i32
    scf.if %76 {
      %c0_48 = arith.constant 0 : index
      %c0_49 = arith.constant 0 : index
      %c0_50 = arith.constant 0 : index
      %77 = vector.load %arg16[%c0_48, %c0_49, %c0_50] : memref<1x8x32xf32, #tpu.memory_space<vmem>>, vector<1x8x32xf32>
      %78 = vector.shape_cast %77 : vector<1x8x32xf32> to vector<8x32xf32>
      %79 = arith.addf %78, %70 : vector<8x32xf32>
      %c0_51 = arith.constant 0 : index
      %c0_52 = arith.constant 0 : index
      %c0_53 = arith.constant 0 : index
      %80 = vector.load %arg16[%c0_51, %c0_52, %c0_53] : memref<1x8x32xf32, #tpu.memory_space<vmem>>, vector<1x8x32xf32>
      %81 = vector.shape_cast %80 : vector<1x8x32xf32> to vector<8x32xf32>
      %82 = vector.shape_cast %79 : vector<8x32xf32> to vector<1x8x32xf32>
      tpu.vector_store %arg16[%c0_51, %c0_52, %c0_53], %82 {strides = array<i32>} : memref<1x8x32xf32, #tpu.memory_space<vmem>>, vector<1x8x32xf32>,
    } else {
    }
    return
  }
  func.func @transform_0(%arg0: i32, %arg1: i32, %arg2: i32) -> (i32, i32, i32) {
    %c0_i32 = arith.constant 0 : i32
    %c0_i32_0 = arith.constant 0 : i32
    return %arg0, %arg1, %c0_i32 : i32, i32, i32
  }
  func.func @transform_1(%arg0: i32, %arg1: i32, %arg2: i32) -> (i32, i32, i32) {
    %c0_i32 = arith.constant 0 : i32
    %c0_i32_0 = arith.constant 0 : i32
    %c0_i32_1 = arith.constant 0 : i32
    return %arg0, %c0_i32, %c0_i32_0 : i32, i32, i32
  }
  func.func @transform_2(%arg0: i32, %arg1: i32, %arg2: i32) -> (i32, i32, i32) {
    %c0_i32 = arith.constant 0 : i32
    %c0_i32_0 = arith.constant 0 : i32
    %c0_i32_1 = arith.constant 0 : i32
    return %arg0, %c0_i32, %c0_i32_0 : i32, i32, i32
  }
  func.func @transform_3(%arg0: i32, %arg1: i32, %arg2: i32) -> (i32, i32, i32) {
    %c0_i32 = arith.constant 0 : i32
    %c0_i32_0 = arith.constant 0 : i32
    return %arg0, %arg1, %c0_i32 : i32, i32, i32
  }
  func.func @transform_4(%arg0: i32, %arg1: i32, %arg2: i32) -> (i32, i32, i32) {
    %c0_i32 = arith.constant 0 : i32
    %c0_i32_0 = arith.constant 0 : i32
    %c0_i32_1 = arith.constant 0 : i32
    return %arg2, %c0_i32, %c0_i32_0 : i32, i32, i32
  }
  func.func @transform_5(%arg0: i32, %arg1: i32, %arg2: i32) -> (i32, i32, i32) {
    %c0_i32 = arith.constant 0 : i32
    %c0_i32_0 = arith.constant 0 : i32
    %c0_i32_1 = arith.constant 0 : i32
    return %arg2, %c0_i32, %c0_i32_0 : i32, i32, i32
  }
  func.func @transform_6(%arg0: i32, %arg1: i32, %arg2: i32) -> (i32, i32, i32) {
    %c0_i32 = arith.constant 0 : i32
    %c0_i32_0 = arith.constant 0 : i32
    %c0_i32_1 = arith.constant 0 : i32
    return %arg2, %c0_i32, %c0_i32_0 : i32, i32, i32
  }
  func.func @transform_7(%arg0: i32, %arg1: i32, %arg2: i32) -> (i32, i32) {
    %c0_i32 = arith.constant 0 : i32
    %c0_i32_0 = arith.constant 0 : i32
    %c0_i32_1 = arith.constant 0 : i32
    return %c0_i32, %c0_i32_0 : i32, i32
  }
  func.func @transform_8(%arg0: i32, %arg1: i32, %arg2: i32) -> (i32, i32) {
    %c0_i32 = arith.constant 0 : i32
    %c0_i32_0 = arith.constant 0 : i32
    %c0_i32_1 = arith.constant 0 : i32
    return %c0_i32, %c0_i32_0 : i32, i32
  }
  func.func @transform_9(%arg0: i32, %arg1: i32, %arg2: i32) -> (i32, i32, i32) {
    %c0_i32 = arith.constant 0 : i32
    %c0_i32_0 = arith.constant 0 : i32
    %c0_i32_1 = arith.constant 0 : i32
    return %arg2, %c0_i32, %c0_i32_0 : i32, i32, i32
  }
  func.func @transform_10(%arg0: i32, %arg1: i32, %arg2: i32) -> (i32, i32) {
    %c0_i32 = arith.constant 0 : i32
    %c0_i32_0 = arith.constant 0 : i32
    %c0_i32_1 = arith.constant 0 : i32
    return %c0_i32, %c0_i32_0 : i32, i32
  }
  func.func @transform_11(%arg0: i32, %arg1: i32, %arg2: i32) -> (i32, i32) {
    %c0_i32 = arith.constant 0 : i32
    %c0_i32_0 = arith.constant 0 : i32
    %c0_i32_1 = arith.constant 0 : i32
    return %c0_i32, %c0_i32_0 : i32, i32
  }
  func.func @transform_12(%arg0: i32, %arg1: i32, %arg2: i32) -> (i32, i32) {
    %c0_i32 = arith.constant 0 : i32
    %c0_i32_0 = arith.constant 0 : i32
    %c0_i32_1 = arith.constant 0 : i32
    return %c0_i32, %c0_i32_0 : i32, i32
  }
  func.func @transform_13(%arg0: i32, %arg1: i32, %arg2: i32) -> (i32, i32, i32) {
    %c0_i32 = arith.constant 0 : i32
    %c0_i32_0 = arith.constant 0 : i32
    return %arg0, %arg1, %c0_i32 : i32, i32, i32
  }
  func.func @transform_14(%arg0: i32, %arg1: i32, %arg2: i32) -> (i32, i32, i32, i32) {
    %c0_i32 = arith.constant 0 : i32
    %c0_i32_0 = arith.constant 0 : i32
    return %arg2, %arg0, %arg1, %c0_i32 : i32, i32, i32, i32
  }
}

</mosaic_0001>

<bundles_post_ra>
// kernel: tpu_custom_call.1
= control target key start
LH: loop header
LB: loop body
LE: loop exit
PB: predicated region body
PF: predicated region fallthrough
CT: control target
= control target key end

     0   :  { %s3571_s0 = inlined_call_operand.hbm [shape: f32[2,8,32], index: 0, kind: input, shape index: {}]   ;;  %s3572_s1 = inlined_call_operand.hbm [shape: f32[2,8,32], index: 1, kind: input, shape index: {}]   ;;  %s3573_s2 = inlined_call_operand.hbm [shape: f32[2,8,32], index: 2, kind: input, shape index: {}]   ;;  %s3574_s3 = inlined_call_operand.hbm [shape: s32[2,8,8], index: 3, kind: input, shape index: {}]   ;;  %s3575_s4 = inlined_call_operand.hbm [shape: bf16[2,32,16], index: 4, kind: input, shape index: {}]   ;;  %s3576_s5 = inlined_call_operand.hbm [shape: bf16[2,32,16], index: 5, kind: input, shape index: {}]   ;;  %s3577_s6 = inlined_call_operand.hbm [shape: bf16[2,32,16], index: 6, kind: input, shape index: {}]   ;;  %s3578_s7 = inlined_call_operand.hbm [shape: f32[1,32], index: 7, kind: input, shape index: {}]   ;;  %s3579_s8 = inlined_call_operand.hbm [shape: f32[1,32], index: 8, kind: input, shape index: {}]   ;;  %s3580_s9 = inlined_call_operand.hbm [shape: bf16[2,16,32], index: 9, kind: input, shape index: {}]   ;;  %s3581_s10 = inlined_call_operand.hbm [shape: f32[1,32], index: 10, kind: input, shape index: {}]   ;;  %s3582_s11 = inlined_call_operand.hbm [shape: bf16[32,32], index: 11, kind: input, shape index: {}]   ;;  %s3583_s12 = inlined_call_operand.hbm [shape: f32[1,32], index: 12, kind: input, shape index: {}]   ;;  %s3584_s13 = inlined_call_operand.hbm [shape: f32[2,8,32], index: 13, kind: output, shape index: {0}]   ;;  %s3585_s14 = inlined_call_operand.hbm [shape: f32[2,2,8,8], index: 14, kind: output, shape index: {1}]  }
   0x1   :  { %3649 = sst [smem:[#allocation60_spill]] %s3571_s0 }
   0x2   :  { %3650 = sst [smem:[#allocation61_spill]] %s3572_s1 }
   0x3   :  { %3651 = sst [smem:[#allocation62_spill]] %s3573_s2 }
   0x4   :  { %3652 = sst [smem:[#allocation63_spill]] %s3574_s3 }
   0x5   :  { %3653 = sst [smem:[#allocation64_spill]] %s3575_s4 }
   0x6   :  { %3654 = sst [smem:[#allocation65_spill]] %s3576_s5 }
   0x7   :  { %3655 = sst [smem:[#allocation66_spill]] %s3577_s6 }
   0x8   :  { %3656 = sst [smem:[#allocation67_spill]] %s3578_s7 }
   0x9   :  { %3657 = sst [smem:[#allocation68_spill]] %s3579_s8 }
   0xa   :  { %3658 = sst [smem:[#allocation69_spill]] %s3580_s9 }
   0xb   :  { %3659 = sst [smem:[#allocation70_spill]] %s3581_s10 }
   0xc   :  { %3660 = sst [smem:[#allocation71_spill]] %s3582_s11 }
   0xd   :  { %3661 = sst [smem:[#allocation72_spill]] %s3583_s12 }
   0xe   :  { %3662 = sst [smem:[#allocation73_spill]] %s3584_s13 }
   0xf   :  { %3663 = sst [smem:[#allocation74_spill]] %s3585_s14 }
  0x10   :  { %20 = vsyncpa [#allocation3], 0 }
  0x11   :  { %22 = vsyncpa [#allocation3 + $0x1], 0 }
  0x12   :  { %23 = vsyncpa [#allocation6], 0 }
  0x13   :  { %25 = vsyncpa [#allocation6 + $0x1], 0 }
  0x14   :  { %26 = vsyncpa [#allocation9], 0 }
  0x15   :  { %28 = vsyncpa [#allocation9 + $0x1], 0 }
  0x16   :  { %29 = vsyncpa [#allocation12], 0 }
  0x17   :  { %31 = vsyncpa [#allocation12 + $0x1], 0 }
  0x18   :  { %32 = vsyncpa [#allocation15], 0 }
  0x19   :  { %33 = vsyncpa [#allocation18], 0 }
  0x1a   :  { %35 = vsyncpa [#allocation18 + $0x1], 0 }
  0x1b   :  { %36 = vsyncpa [#allocation21], 0 }
  0x1c   :  { %37 = vsyncpa [#allocation4], 0 }
  0x1d   :  { %39 = vsyncpa [#allocation4 + $0x1], 0 }
  0x1e   :  { %40 = vsyncpa [#allocation25], 0 }
  0x1f   :  { %42 = vsyncpa [#allocation25 + $0x1], 0  ;;  %s2750_s29 = smov 0   ;;  %s2752_s30 = smov 0  }
  0x20   :  { %s2754_s15 = smov 0   ;;  %s2756_s16 = smov 0  }
  0x21   :  { %s2758_s17 = smov 0   ;;  %s2760_s18 = smov 0  }
  0x22   :  { %s2762_s19 = smov 0   ;;  %s2764_s20 = smov 0  }
  0x23   :  { %s2766_s21 = smov 0   ;;  %s2768_s22 = smov 0  }
  0x24   :  { %s2770_s23 = smov 0   ;;  %s2772_s24 = smov 0  }
  0x25   :  { %s2774_s25 = smov 0   ;;  %s2776_s26 = smov 0  }
  0x26 LB: > { %3664 = sst [smem:[#allocation37_spill]] %s2600_s29  ;;  %s2821_s27 = sadd.s32 4294967295, %s2652_s26   ;;  %s2652_s26 = sphi %s2776_s26, %s48_s26   ;;  %s2648_s25 = sphi %s2774_s25, %s3798_s25   ;;  %s2644_s24 = sphi %s2772_s24, %s3789_s24   ;;  %s2640_s23 = sphi %s2770_s23, %s3788_s23   ;;  %s2636_s22 = sphi %s2768_s22, %s3787_s22   ;;  %s2632_s21 = sphi %s2766_s21, %s3797_s21   ;;  %s2628_s20 = sphi %s2764_s20, %s3796_s20   ;;  %s2624_s19 = sphi %s2762_s19, %s3785_s19   ;;  %s2620_s18 = sphi %s2760_s18, %s3795_s18   ;;  %s2616_s17 = sphi %s2758_s17, %s3794_s17   ;;  %s2612_s16 = sphi %s2756_s16, %s3783_s16   ;;  %s2608_s15 = sphi %s2754_s15, %s3793_s15   ;;  %s2604_s30 = sphi %s2752_s30, %s3792_s30   ;;  %s2600_s29 = sphi %s2750_s29, %s3781_s29  }
  0x27   : > { %3665 = sst [smem:[#allocation38_spill]] %s2604_s30  ;;  %p1680_p0 = scmp.ge.s32.totalorder %s2652_s26, 1 }
  0x28   : > { %3666 = sst [smem:[#allocation39_spill]] %s2616_s17  ;;  %p3597_p1 = scmp.eq.s32.totalorder %s2821_s27, 0 }
  0x29   : > { %3667 = sst [smem:[#allocation40_spill]] %s2624_s19  ;;  %p447_p2 = scmp.lt.s32.totalorder %s2652_s26, 5 }
  0x2a   : > { %3668 = sst [smem:[#allocation41_spill]] %s2628_s20  ;;  %s2654_s14 = smov [#allocation14]  }
  0x2b   : > { %3669 = sst [smem:[#allocation42_spill]] %s2636_s22  ;;  %p2826_p3 = pnand %p1680_p0, %p447_p2 }
  0x2c   : > { %3670 = sst [smem:[#allocation43_spill]] %s2640_s23  ;;  %s460_s13 = sshll.u32 %s2654_s14, 4  ;;  %s461_s13 = int_to_ptr.vmem [resolvable:$true] %s460_s13 }
  0x2d   : > { %3671 = sst [smem:[#allocation44_spill]] %s2644_s24  ;;  %p1864_p4 = pneg %p2826_p3 }
  0x2e   : > { %3672 = sst [smem:[#allocation45_spill]] %s2648_s25  ;;  %s2655_s23 = smov [#allocation19]  }
  0x2f   : > { %3673 = sst [smem:[#allocation46_spill]] %s2652_s26  ;;  %s482_s22 = sshll.u32 %s2655_s23, 4  ;;  %s2838_s22 = int_to_ptr.vmem [resolvable:$true] %s482_s22 }
  0x30   : > { %3674 = sst [smem:[#allocation47_spill]] %s2821_s27  ;;  %p2834_p5 = pnand %p1864_p4, %p3597_p1 }
  0x31   : > { %s3675_s28 = scalar_select %p2826_p3, 1, 0 }
  0x32   : > { %s3677_s9 = scalar_select %p2834_p5, 1, 0 }
  0x33   : > { %3676 = sst [smem:[#allocation48_spill]] %s3675_s28  ;;  %s2656_s6 = smov [#allocation20]  }
  0x34   : > { %s492_s4 = sshll.u32 %s2656_s6, 4  ;;  %s3678_s7 = sld [smem:[#allocation67_spill]]  ;;  %s2840_s4 = int_to_ptr.vmem [resolvable:$true] %s492_s4 }
  0x35   : > { %p2850_p7 = pneg %p2834_p5 }
  0x37   : > { %s3679_s23 = scalar_select %p2850_p7, 1, 0 }
  0x3a   : > { %s2062_s14 = scalar_lea.hbm %s3678_s7, 16 }
  0x3b   : > { %p2063_p6 = scmp.ne.s32.totalorder %s3678_s7, %s2062_s14  ;;  %p2069_p10 = scmp.lt.u32.totalorder %s2062_s14, %s3678_s7 }
  0x3d   : > { %p2065_p8 = pnand %p2850_p7, %p2063_p6 }
  0x3f   : > { %p2066_p9 = pneg %p2065_p8 }
  0x41   : > { %p2071_p11 = pnand %p2069_p10, %p2066_p9 }
  0x43   : > { %2074 = shalt.err (!%p2071_p11)
}
  0x44   : > { %s2075_s0 = scalar_lea.vmem %s461_s13, 16  ;;  %s2082_s2 = scalar_lea.vmem %s461_s13, 32 }
  0x45   : > { %p2076_p12 = scmp.ne.s32.totalorder %s461_s13, %s2075_s0  ;;  %p2083_p2 = scmp.lt.s32.totalorder %s461_s13, %s461_s13 }
  0x46   : > { %p2084_p4 = scmp.lt.s32.totalorder %s2082_s2, %s2075_s0 }
  0x47   : > { %p2078_p13 = pnand %p2076_p12, %p2850_p7 }
  0x48   : > { %p2085_p1 = por %p2084_p4, %p2083_p2 }
  0x49   : > { %p2079_p0 = pneg %p2078_p13 }
  0x4b   : > { %p2086_p3 = pnand %p2085_p1, %p2079_p0 }
  0x4d   : > { %2089 = shalt.err (!%p2086_p3)
}
  0x4e   : > { %1867 = dma.hbm_to_vmem [thread:$0]  (!%p2834_p5), %s3678_s7, 16, %s461_s13, [#allocation15]  }
  0x4f   : > { %s3680_s10 = sld [smem:[#allocation70_spill]] }
  0x55   : > { %s2090_s6 = scalar_lea.hbm %s3680_s10, 16 }
  0x56   : > { %p2091_p6 = scmp.ne.s32.totalorder %s3680_s10, %s2090_s6  ;;  %p2097_p1 = scmp.lt.u32.totalorder %s2090_s6, %s3680_s10 }
  0x58   : > { %p2093_p8 = pnand %p2091_p6, %p2850_p7 }
  0x5a   : > { %p2094_p9 = pneg %p2093_p8 }
  0x5c   : > { %p2099_p3 = pnand %p2097_p1, %p2094_p9 }
  0x5e   : > { %2102 = shalt.err (!%p2099_p3)
}
  0x5f   : > { %s2103_s13 = scalar_lea.vmem %s2838_s22, 16  ;;  %s2110_s5 = scalar_lea.vmem %s2838_s22, 32 }
  0x60   : > { %p2104_p10 = scmp.ne.s32.totalorder %s2838_s22, %s2103_s13  ;;  %p2111_p13 = scmp.lt.s32.totalorder %s2838_s22, %s2838_s22 }
  0x61   : > { %p2112_p0 = scmp.lt.s32.totalorder %s2110_s5, %s2103_s13 }
  0x62   : > { %p2106_p11 = pnand %p2104_p10, %p2850_p7 }
  0x63   : > { %p2113_p2 = por %p2112_p0, %p2111_p13 }
  0x64   : > { %p2107_p12 = pneg %p2106_p11 }
  0x66   : > { %p2114_p4 = pnand %p2113_p2, %p2107_p12 }
  0x68   : > { %2117 = shalt.err (!%p2114_p4)
}
  0x69   : > { %1873 = dma.hbm_to_vmem [thread:$0]  (!%p2834_p5), %s3680_s10, 16, %s2838_s22, [#allocation18]  }
  0x6a   : > { %s3681_s11 = sld [smem:[#allocation71_spill]] }
  0x70   : > { %s2118_s14 = scalar_lea.hbm %s3681_s11, 256 }
  0x71   : > { %p2119_p6 = scmp.ne.s32.totalorder %s3681_s11, %s2118_s14  ;;  %p2125_p1 = scmp.lt.u32.totalorder %s2118_s14, %s3681_s11 }
  0x73   : > { %p2121_p8 = pnand %p2119_p6, %p2850_p7 }
  0x75   : > { %p2122_p9 = pneg %p2121_p8 }
  0x77   : > { %p2127_p3 = pnand %p2125_p1, %p2122_p9 }
  0x79   : > { %2130 = shalt.err (!%p2127_p3)
}
  0x7a   : > { %s2131_s22 = scalar_lea.vmem %s2840_s4, 256  ;;  %p2139_p13 = scmp.lt.s32.totalorder %s2840_s4, %s2840_s4 }
  0x7b   : > { %p2132_p10 = scmp.ne.s32.totalorder %s2840_s4, %s2131_s22  ;;  %p2140_p0 = scmp.lt.s32.totalorder %s2131_s22, %s2131_s22 }
  0x7d   : > { %p2134_p11 = pnand %p2132_p10, %p2850_p7  ;;  %p2141_p2 = por %p2140_p0, %p2139_p13 }
  0x7f   : > { %p2135_p12 = pneg %p2134_p11 }
  0x81   : > { %p2142_p4 = pnand %p2141_p2, %p2135_p12 }
  0x83   : > { %2145 = shalt.err (!%p2142_p4)
}
  0x84   : > { %s3606_s5 = smov 64   ;;  %s3608_s24 = smov 4  }
  0x85   : > { %1876 = dma.hbm_to_vmem [thread:$0]  (!%p2834_p5), %s3681_s11, 256, %s2840_s4, [#allocation21], %s3606_s5, %s3606_s5, %s3608_s24  }
  0x86   : > { %s1679_s8 = sadd.s32 4294967294, %s2652_s26   ;;  %p83_p6 = scmp.ne.s32.totalorder %s2632_s21, %s2628_s20 }
  0x87   : > { %p84_p8 = scmp.eq.s32.totalorder %s2652_s26, 0  ;;  %p89_p9 = scmp.ne.s32.totalorder %s2628_s20, %s2624_s19 }
  0x88   : > { %p189_p1 = scmp.ne.s32.totalorder %s2620_s18, %s2616_s17  ;;  %p195_p10 = scmp.ne.s32.totalorder %s2616_s17, %s2612_s16 }
  0x89   : > { %p2926_p3 = por %p84_p8, %p83_p6  ;;  %p3683_p11 = scmp.eq.s32.totalorder %s2821_s27, 0 }
  0x8a   : > { %p2938_p13 = por %p189_p1, %p84_p8  ;;  %p404_p4 = scmp.eq.s32.totalorder %s2821_s27, 3 }
  0x8b   : > { %s3682_s0 = scalar_select %p2926_p3, 1, 0 }
  0x8c   : > { %p2934_p12 = por %p3683_p11, %p89_p9  ;;  %p3687_p0 = pmov %p3683_p11 }
  0x8d   : > { %p410_p5 = scmp.eq.s32.totalorder %s1679_s8, 3  ;;  %p433_p7 = scmp.ne.s32.totalorder %s2608_s15, %s2604_s30 }
  0x8e   : > { %s3684_s4 = scalar_select %p2934_p12, 1, 0 }
  0x8f   : > { %p2944_p2 = por %p195_p10, %p3687_p0  ;;  %p2951_p3 = por %p404_p4, %p83_p6 }
  0x90   : > { %3685 = sst [smem:[#allocation49_spill]] %s3684_s4  ;;  %p439_p11 = scmp.ne.s32.totalorder %s2604_s30, %s2600_s29 }
  0x91   : > { %s3688_s13 = scalar_select %p2944_p2, 1, 0 }
  0x92   : > { %s3690_s16 = scalar_select %p2951_p3, 1, 0 }
  0x93   : > { %3689 = sst [smem:[#allocation50_spill]] %s3688_s13  ;;  %p2957_p12 = por %p410_p5, %p89_p9 }
  0x94   : > { %3691 = sst [smem:[#allocation51_spill]] %s3690_s16  ;;  %p2961_p8 = por %p433_p7, %p404_p4 }
  0x95   : > { %s3692_s22 = scalar_select %p2957_p12, 1, 0 }
  0x96   : > { %s3694_s12 = scalar_select %p2961_p8, 1, 0 }
  0x97   : > { %3693 = sst [smem:[#allocation52_spill]] %s3692_s22  ;;  %p2965_p1 = por %p439_p11, %p410_p5 }
  0x98   : > { %3695 = sst [smem:[#allocation53_spill]] %s3694_s12  ;;  %p1917_p10 = scmp.lt.s32.totalorder %s2652_s26, 4 }
  0x99   : > { %s3696_s28 = scalar_select %p2965_p1, 1, 0 }
  0x9a   : > { %s3610_s8 = sand.u32 1, %s2632_s21   ;;  %s2972_s5 = sshll.u32 %s2648_s25, 7 }
  0x9b   : > { %3697 = sst [smem:[#allocation54_spill]] %s3696_s28  ;;  %s2976_s24 = sshll.u32 %s3610_s8, 3 }
  0x9c   : > { %p3698_p6 = scmp.ne.s32.totalorder %s3682_s0, 0  ;;  %s2985_s14 = sand.u32 1, %s2652_s26  }
  0x9d   : > { %s3700_s1 = sld [smem:[#allocation61_spill]]  ;;  %s540_s8 = scalar_lea.vmem [#allocation5], %s2976_s24 }
  0x9e   : > { %p2980_p9 = pnand %p1917_p10, %p3698_p6  ;;  %s547_s0 = sshll.u32 %s540_s8, 4  ;;  %s2994_s0 = int_to_ptr.vmem [resolvable:$true] %s547_s0 }
  0x9f   : > { %p2998_p5 = pnand %p1917_p10, %p2938_p13 }
  0xa0   : > { %s3699_s6 = scalar_select %p2980_p9, 1, 0 }
  0xa1   : > { %s3701_s28 = scalar_select %p2998_p5, 1, 0 }
  0xa2   : > { %p3007_p0 = pneg %p2980_p9 }
  0xa3   : > { %s2991_s11 = scalar_lea.hbm %s3700_s1, %s2972_s5  ;;  %s2151_s2 = scalar_lea.hbm %s3700_s1, 256 }
  0xa4   : > { %s2146_s22 = scalar_lea.hbm %s2991_s11, 128  ;;  %p2152_p13 = scmp.lt.u32.totalorder %s2991_s11, %s3700_s1 }
  0xa5   : > { %p2147_p7 = scmp.ne.s32.totalorder %s2991_s11, %s2146_s22  ;;  %p2153_p10 = scmp.lt.u32.totalorder %s2151_s2, %s2146_s22 }
  0xa6   : > { %s3702_s7 = scalar_select %p3007_p0, 1, 0 }
  0xa7   : > { %p2149_p4 = pnand %p3007_p0, %p2147_p7  ;;  %p2154_p6 = por %p2153_p10, %p2152_p13 }
  0xa8   : > { %p2155_p1 = scmp.lt.u32.totalorder %s2146_s22, %s2991_s11 }
  0xa9   : > { %p2150_p11 = pneg %p2149_p4 }
  0xaa   : > { %p2156_p12 = por %p2155_p1, %p2154_p6 }
  0xac   : > { %p2157_p8 = pnand %p2156_p12, %p2150_p11 }
  0xae   : > { %2160 = shalt.err (!%p2157_p8)
}
  0xaf   : > { %s2161_s29 = scalar_lea.vmem %s2994_s0, 128  ;;  %s2659_s10 = smov [#allocation5]  }
  0xb0   : > { %p2162_p7 = scmp.ne.s32.totalorder %s2994_s0, %s2161_s29  ;;  %s2166_s8 = sshll.u32 %s2659_s10, 4  ;;  %s2167_s8 = int_to_ptr.vmem [resolvable:$false] %s2166_s8 }
  0xb1   : > { %s2168_s19 = scalar_lea.vmem %s2167_s8, 256  ;;  %p2169_p2 = scmp.lt.s32.totalorder %s2994_s0, %s2167_s8 }
  0xb2   : > { %p2164_p4 = pnand %p2162_p7, %p3007_p0  ;;  %p2170_p5 = scmp.lt.s32.totalorder %s2168_s19, %s2161_s29 }
  0xb4   : > { %p2165_p3 = pneg %p2164_p4  ;;  %p2171_p13 = por %p2170_p5, %p2169_p2 }
  0xb6   : > { %p2172_p10 = pnand %p2171_p13, %p2165_p3 }
  0xb8   : > { %2175 = shalt.err (!%p2172_p10)
}
  0xb9   : > { %s3703_s26 = scalar_lea.sflag [#allocation6], %s2985_s14  ;;  %s3704_s3 = sld [smem:[#allocation63_spill]] }
  0xba   : > { %1886 = dma.hbm_to_vmem [thread:$0]  (!%p2980_p9), %s2991_s11, 128, %s2994_s0, %s3703_s26  }
  0xbb   : > { %s576_s29 = scalar_lea.vmem [#allocation8], %s2976_s24 }
  0xbc   : > { %s584_s8 = sshll.u32 %s576_s29, 4  ;;  %s585_s8 = int_to_ptr.vmem [resolvable:$true] %s584_s8 }
  0xbf   : > { %s3036_s10 = scalar_lea.hbm %s3704_s3, %s2972_s5  ;;  %s2181_s0 = scalar_lea.hbm %s3704_s3, 256 }
  0xc0   : > { %s2176_s1 = scalar_lea.hbm %s3036_s10, 128  ;;  %p2182_p8 = scmp.lt.u32.totalorder %s3036_s10, %s3704_s3 }
  0xc1   : > { %p2177_p3 = scmp.ne.s32.totalorder %s3036_s10, %s2176_s1  ;;  %p2183_p1 = scmp.lt.u32.totalorder %s2181_s0, %s2176_s1 }
  0xc2   : > { %p2185_p11 = scmp.lt.u32.totalorder %s2176_s1, %s3036_s10 }
  0xc3   : > { %p2179_p12 = pnand %p2177_p3, %p3007_p0  ;;  %p2184_p5 = por %p2183_p1, %p2182_p8 }
  0xc5   : > { %p2180_p2 = pneg %p2179_p12  ;;  %p2186_p6 = por %p2185_p11, %p2184_p5 }
  0xc7   : > { %p2187_p7 = pnand %p2186_p6, %p2180_p2 }
  0xc9   : > { %2190 = shalt.err (!%p2187_p7)
}
  0xca   : > { %s2191_s2 = scalar_lea.vmem %s585_s8, 128  ;;  %s2660_s29 = smov [#allocation8]  }
  0xcb   : > { %p2192_p4 = scmp.ne.s32.totalorder %s585_s8, %s2191_s2  ;;  %s2196_s19 = sshll.u32 %s2660_s29, 4  ;;  %s2197_s19 = int_to_ptr.vmem [resolvable:$false] %s2196_s19 }
  0xcc   : > { %s2198_s12 = scalar_lea.vmem %s2197_s19, 256  ;;  %p2199_p3 = scmp.lt.s32.totalorder %s585_s8, %s2197_s19 }
  0xcd   : > { %p2194_p13 = pnand %p2192_p4, %p3007_p0  ;;  %p2200_p12 = scmp.lt.s32.totalorder %s2198_s12, %s2191_s2 }
  0xcf   : > { %p2195_p10 = pneg %p2194_p13  ;;  %p2201_p9 = por %p2200_p12, %p2199_p3 }
  0xd1   : > { %p2202_p1 = pnand %p2201_p9, %p2195_p10 }
  0xd3   : > { %2205 = shalt.err (!%p2202_p1)
}
  0xd4   : > { %p3705_p8 = scmp.ne.s32.totalorder %s3699_s6, 0  ;;  %s3706_s1 = scalar_lea.sflag [#allocation9], %s2985_s14 }
  0xd5   : > { %s3707_s11 = sld [smem:[#allocation44_spill]]  ;;  %s182_s19 = sadd.s32 1, %s2620_s18 }
  0xd6   : > { %1892 = dma.hbm_to_vmem [thread:$0]  (!%p3705_p8), %s3036_s10, 128, %s585_s8, %s3706_s1  }
  0xd7   : > { %s423_s26 = sadd.s32 1, %s2608_s15  ;;  %s3625_s22 = sand.u32 1, %s2620_s18  }
  0xd8   : > { %s3065_s2 = sshll.u32 %s3625_s22, 4  ;;  %s3709_s12 = sadd.s32 1, %s2648_s25 }
  0xd9   : > { %s3710_s22 = sld [smem:[#allocation65_spill]]  ;;  %s616_s17 = scalar_lea.vmem [#allocation11], %s3065_s2 }
  0xda   : > { %s623_s27 = sshll.u32 %s616_s17, 4  ;;  %s3714_s8 = sadd.s32 1, %s2632_s21  ;;  %s3091_s27 = int_to_ptr.vmem [resolvable:$true] %s623_s27 }
  0xdb   : > { %s60_s0 = sadd.s32 1, %s3707_s11  ;;  %s3068_s29 = sshll.u32 %s3707_s11, 8 }
  0xdc   : > { %p61_p9 = scmp.ge.s32.totalorder %s60_s0, 2  ;;  %s3647_s4 = scalar_lea.sflag [#allocation12], %s2985_s14 }
  0xdd   : > { %p3717_p4 = scmp.ne.s32.totalorder %s3701_s28, 0 }
  0xde   : > { %s3800_s0 = smov (%p61_p9, %s60_s0), 0  ;;  %s3802_s12 = smov (!%p61_p9, %s3709_s12), %s2648_s25 }
  0xdf   : > { %3708 = sst [smem:[#allocation55_spill]] %s3800_s0  ;;  %s179_s10 = ssub.s32 %s3707_s11, %s3800_s0 }
  0xe0   : > { %p69_p2 = scmp.ge.s32.totalorder %s3802_s12, 2  ;;  %p180_p5 = scmp.eq.s32.totalorder %s179_s10, 0 }
  0xe1   : > { %s3711_s3 = smov %s3710_s22  ;;  %s3081_s16 = scalar_lea.hbm %s3710_s22, %s3068_s29 }
  0xe2   : > { %s3804_s12 = smov (%p69_p2, %s3802_s12), 0  ;;  %s2206_s20 = scalar_lea.hbm %s3081_s16, 256 }
  0xe3   : > { %3712 = sst [smem:[#allocation56_spill]] %s3804_s12  ;;  %s71_s13 = ssub.s32 %s2648_s25, %s3804_s12 }
  0xe4   : > { %s3086_s30 = scalar_select %p180_p5, %s2620_s18, %s182_s19  }
  0xe5   : > { %p74_p11 = scmp.eq.s32.totalorder %s71_s13, 0  ;;  %s418_s0 = sor.u32 %s179_s10, %s71_s13 }
  0xe6   : > { %3713 = sst [smem:[#allocation57_spill]] %s3086_s30  ;;  %p421_p6 = scmp.eq.s32.totalorder %s418_s0, 0 }
  0xe7   : > { %s3096_s22 = scalar_select %p74_p11, %s2632_s21, %s3714_s8  }
  0xe8   : > { %s3099_s1 = scalar_select %p421_p6, %s2608_s15, %s423_s26  }
  0xe9   : > { %3715 = sst [smem:[#allocation58_spill]] %s3096_s22  ;;  %p2207_p7 = scmp.ne.s32.totalorder %s3081_s16, %s2206_s20 }
  0xea   : > { %3716 = sst [smem:[#allocation59_spill]] %s3099_s1  ;;  %p3106_p13 = pneg %p3717_p4 }
  0xeb   : > { %s2211_s0 = scalar_lea.hbm %s3711_s3, 512  ;;  %p2212_p12 = scmp.lt.u32.totalorder %s3081_s16, %s3711_s3 }
  0xec   : > { %s3718_s19 = scalar_select %p3106_p13, 1, 0 }
  0xed   : > { %p2209_p10 = pnand %p3106_p13, %p2207_p7  ;;  %p2213_p1 = scmp.lt.u32.totalorder %s2211_s0, %s2206_s20 }
  0xee   : > { %p2215_p2 = scmp.lt.u32.totalorder %s2206_s20, %s3081_s16 }
  0xef   : > { %p2210_p3 = pneg %p2209_p10  ;;  %p2214_p9 = por %p2213_p1, %p2212_p12 }
  0xf1   : > { %p2216_p5 = por %p2215_p2, %p2214_p9 }
  0xf3   : > { %p2217_p11 = pnand %p2216_p5, %p2210_p3 }
  0xf5   : > { %2220 = shalt.err (!%p2217_p11)
}
  0xf6   : > { %s2221_s26 = scalar_lea.vmem %s3091_s27, 256  ;;  %s2661_s17 = smov [#allocation11]  }
  0xf7   : > { %p2222_p6 = scmp.ne.s32.totalorder %s3091_s27, %s2221_s26  ;;  %s2226_s13 = sshll.u32 %s2661_s17, 4  ;;  %s2227_s13 = int_to_ptr.vmem [resolvable:$false] %s2226_s13 }
  0xf8   : > { %s2228_s10 = scalar_lea.vmem %s2227_s13, 512  ;;  %p2229_p8 = scmp.lt.s32.totalorder %s3091_s27, %s2227_s13 }
  0xf9   : > { %p2224_p7 = pnand %p2222_p6, %p3106_p13  ;;  %p2230_p0 = scmp.lt.s32.totalorder %s2228_s10, %s2221_s26 }
  0xfb   : > { %p2225_p10 = pneg %p2224_p7  ;;  %p2231_p12 = por %p2230_p0, %p2229_p8 }
  0xfd   : > { %p2232_p1 = pnand %p2231_p12, %p2225_p10 }
  0xff   : > { %2235 = shalt.err (!%p2232_p1)
}
 0x100   : > { %s3719_s20 = smov 4   ;;  %s3720_s0 = smov 64  }
 0x101   : > { %1898 = dma.hbm_to_vmem [thread:$0]  (!%p3717_p4), %s3081_s16, 256, %s3091_s27, %s3647_s4, %s3720_s0, %s3720_s0, %s3719_s20  }
 0x102   : > { %s2662_s8 = smov [#allocation16]   ;;  %s2663_s3 = smov [#allocation22]  }
 0x103   : > { %s471_s17 = sshll.u32 %s2662_s8, 4  ;;  %s506_s12 = sshll.u32 %s2663_s3, 4  ;;  %s472_s17 = int_to_ptr.vmem [resolvable:$true] %s471_s17  ;;  %s3134_s12 = int_to_ptr.vmem [resolvable:$true] %s506_s12 }
 0x104   : > { %s3721_s10 = sld [smem:[#allocation68_spill]]  ;;  %p3722_p8 = scmp.ne.s32.totalorder %s3679_s23, 0 }
 0x10a   : > { %s2236_s25 = scalar_lea.hbm %s3721_s10, 16 }
 0x10b   : > { %p2237_p0 = scmp.ne.s32.totalorder %s3721_s10, %s2236_s25  ;;  %p2243_p2 = scmp.lt.u32.totalorder %s2236_s25, %s3721_s10 }
 0x10d   : > { %p2239_p3 = pnand %p2237_p0, %p3722_p8 }
 0x10f   : > { %p2240_p9 = pneg %p2239_p3 }
 0x111   : > { %p2245_p5 = pnand %p2243_p2, %p2240_p9 }
 0x113   : > { %2248 = shalt.err (!%p2245_p5)
}
 0x114   : > { %s2249_s3 = scalar_lea.vmem %s472_s17, 16  ;;  %s2256_s16 = scalar_lea.vmem %s472_s17, 32 }
 0x115   : > { %p2250_p11 = scmp.ne.s32.totalorder %s472_s17, %s2249_s3  ;;  %p2257_p10 = scmp.lt.s32.totalorder %s472_s17, %s472_s17 }
 0x116   : > { %p2258_p12 = scmp.lt.s32.totalorder %s2256_s16, %s2249_s3 }
 0x117   : > { %p2252_p6 = pnand %p2250_p11, %p3722_p8 }
 0x118   : > { %p2259_p1 = por %p2258_p12, %p2257_p10 }
 0x119   : > { %p2253_p7 = pneg %p2252_p6 }
 0x11b   : > { %p2260_p4 = pnand %p2259_p1, %p2253_p7 }
 0x11d   : > { %2263 = shalt.err (!%p2260_p4)
}
 0x11e   : > { %p3723_p0 = scmp.ne.s32.totalorder %s3677_s9, 0  ;;  %s3724_s8 = sld [smem:[#allocation72_spill]] }
 0x120   : > { %1870 = dma.hbm_to_vmem [thread:$0]  (!%p3723_p0), %s3721_s10, 16, %s472_s17, [#allocation15]  }
 0x124   : > { %s2264_s26 = scalar_lea.hbm %s3724_s8, 16 }
 0x125   : > { %p2265_p3 = scmp.ne.s32.totalorder %s3724_s8, %s2264_s26  ;;  %p2271_p4 = scmp.lt.u32.totalorder %s2264_s26, %s3724_s8 }
 0x127   : > { %p2267_p9 = pnand %p2265_p3, %p3722_p8 }
 0x129   : > { %p2268_p2 = pneg %p2267_p9 }
 0x12b   : > { %p2273_p5 = pnand %p2271_p4, %p2268_p2 }
 0x12d   : > { %2276 = shalt.err (!%p2273_p5)
}
 0x12e   : > { %s2277_s17 = scalar_lea.vmem %s3134_s12, 16  ;;  %s2284_s30 = scalar_lea.vmem %s3134_s12, 32 }
 0x12f   : > { %p2278_p11 = scmp.ne.s32.totalorder %s3134_s12, %s2277_s17  ;;  %p2285_p10 = scmp.lt.s32.totalorder %s3134_s12, %s3134_s12 }
 0x130   : > { %p2286_p12 = scmp.lt.s32.totalorder %s2284_s30, %s2277_s17 }
 0x131   : > { %p2280_p6 = pnand %p2278_p11, %p3722_p8 }
 0x132   : > { %p2287_p1 = por %p2286_p12, %p2285_p10 }
 0x133   : > { %p2281_p7 = pneg %p2280_p6 }
 0x135   : > { %p2288_p3 = pnand %p2287_p1, %p2281_p7 }
 0x137   : > { %2291 = shalt.err (!%p2288_p3)
}
 0x138   : > { %1879 = dma.hbm_to_vmem [thread:$0]  (!%p3723_p0), %s3724_s8, 16, %s3134_s12, [#allocation21]  }
 0x139   : > { %s3725_s26 = sld [smem:[#allocation60_spill]]  ;;  %s521_s3 = scalar_lea.vmem [#allocation2], %s2976_s24 }
 0x13a   : > { %s529_s9 = sshll.u32 %s521_s3, 4  ;;  %s3727_s16 = sand.u32 1, %s2632_s21   ;;  %s530_s9 = int_to_ptr.vmem [resolvable:$true] %s529_s9 }
 0x13b   : > { %s518_s17 = scalar_lea.sflag [#allocation3], %s3727_s16  ;;  %p3728_p9 = scmp.ne.s32.totalorder %s3702_s7, 0 }
 0x13f   : > { %s3726_s13 = smov %s3725_s26  ;;  %s3182_s27 = scalar_lea.hbm %s3725_s26, %s2972_s5 }
 0x140   : > { %s2292_s30 = scalar_lea.hbm %s3182_s27, 128  ;;  %s2297_s25 = scalar_lea.hbm %s3726_s13, 256 }
 0x141   : > { %p2293_p8 = scmp.ne.s32.totalorder %s3182_s27, %s2292_s30  ;;  %p2298_p0 = scmp.lt.u32.totalorder %s3182_s27, %s3726_s13 }
 0x142   : > { %p2299_p5 = scmp.lt.u32.totalorder %s2297_s25, %s2292_s30  ;;  %p2301_p6 = scmp.lt.u32.totalorder %s2292_s30, %s3182_s27 }
 0x143   : > { %p2295_p2 = pnand %p2293_p8, %p3728_p9 }
 0x144   : > { %p2300_p11 = por %p2299_p5, %p2298_p0 }
 0x145   : > { %p2296_p4 = pneg %p2295_p2 }
 0x146   : > { %p2302_p7 = por %p2301_p6, %p2300_p11 }
 0x148   : > { %p2303_p10 = pnand %p2302_p7, %p2296_p4 }
 0x14a   : > { %2306 = shalt.err (!%p2303_p10)
}
 0x14b   : > { %s2307_s26 = scalar_lea.vmem %s530_s9, 128  ;;  %s2664_s3 = smov [#allocation2]  }
 0x14c   : > { %p2308_p12 = scmp.ne.s32.totalorder %s530_s9, %s2307_s26  ;;  %s2312_s16 = sshll.u32 %s2664_s3, 4  ;;  %s2313_s16 = int_to_ptr.vmem [resolvable:$false] %s2312_s16 }
 0x14d   : > { %s2314_s12 = scalar_lea.vmem %s2313_s16, 256  ;;  %p2315_p8 = scmp.lt.s32.totalorder %s530_s9, %s2313_s16 }
 0x14e   : > { %p2310_p1 = pnand %p2308_p12, %p3728_p9  ;;  %p2316_p2 = scmp.lt.s32.totalorder %s2314_s12, %s2307_s26 }
 0x150   : > { %p2311_p3 = pneg %p2310_p1  ;;  %p2317_p13 = por %p2316_p2, %p2315_p8 }
 0x152   : > { %p2318_p0 = pnand %p2317_p13, %p2311_p3 }
 0x154   : > { %2321 = shalt.err (!%p2318_p0)
}
 0x155   : > { %p3729_p5 = scmp.ne.s32.totalorder %s3699_s6, 0  ;;  %s3730_s25 = sld [smem:[#allocation62_spill]] }
 0x156   : > { %s558_s26 = scalar_lea.vmem [#allocation7], %s2976_s24 }
 0x157   : > { %1883 = dma.hbm_to_vmem [thread:$0]  (!%p3729_p5), %s3182_s27, 128, %s530_s9, %s518_s17  }
 0x158   : > { %s565_s3 = sshll.u32 %s558_s26, 4  ;;  %s566_s3 = int_to_ptr.vmem [resolvable:$true] %s565_s3 }
 0x15b   : > { %s3731_s1 = smov %s3730_s25  ;;  %s3208_s23 = scalar_lea.hbm %s3730_s25, %s2972_s5 }
 0x15c   : > { %s2322_s16 = scalar_lea.hbm %s3208_s23, 128  ;;  %s2327_s27 = scalar_lea.hbm %s3731_s1, 256 }
 0x15d   : > { %p2323_p13 = scmp.ne.s32.totalorder %s3208_s23, %s2322_s16  ;;  %p2328_p6 = scmp.lt.u32.totalorder %s3208_s23, %s3731_s1 }
 0x15e   : > { %p2329_p7 = scmp.lt.u32.totalorder %s2327_s27, %s2322_s16  ;;  %p2331_p12 = scmp.lt.u32.totalorder %s2322_s16, %s3208_s23 }
 0x15f   : > { %p2325_p4 = pnand %p2323_p13, %p3728_p9 }
 0x160   : > { %p2330_p10 = por %p2329_p7, %p2328_p6 }
 0x161   : > { %p2326_p11 = pneg %p2325_p4 }
 0x162   : > { %p2332_p1 = por %p2331_p12, %p2330_p10 }
 0x164   : > { %p2333_p3 = pnand %p2332_p1, %p2326_p11 }
 0x166   : > { %2336 = shalt.err (!%p2333_p3)
}
 0x167   : > { %s2337_s5 = scalar_lea.vmem %s566_s3, 128  ;;  %s2665_s24 = smov [#allocation7]  }
 0x168   : > { %p2338_p8 = scmp.ne.s32.totalorder %s566_s3, %s2337_s5  ;;  %s2342_s30 = sshll.u32 %s2665_s24, 4  ;;  %s2343_s30 = int_to_ptr.vmem [resolvable:$false] %s2342_s30 }
 0x169   : > { %s2344_s4 = scalar_lea.vmem %s2343_s30, 256  ;;  %p2345_p13 = scmp.lt.s32.totalorder %s566_s3, %s2343_s30 }
 0x16a   : > { %p2340_p2 = pnand %p2338_p8, %p3728_p9  ;;  %p2346_p4 = scmp.lt.s32.totalorder %s2344_s4, %s2337_s5 }
 0x16c   : > { %p2341_p0 = pneg %p2340_p2  ;;  %p2347_p5 = por %p2346_p4, %p2345_p13 }
 0x16e   : > { %p2348_p6 = pnand %p2347_p5, %p2341_p0 }
 0x170   : > { %2351 = shalt.err (!%p2348_p6)
}
 0x171   : > { %p3732_p7 = scmp.ne.s32.totalorder %s3699_s6, 0  ;;  %s3733_s22 = scalar_lea.sflag [#allocation6], %s2985_s14 }
 0x172   : > { %s3734_s26 = sld [smem:[#allocation64_spill]]  ;;  %s595_s27 = scalar_lea.vmem [#allocation10], %s3065_s2 }
 0x173   : > { %1889 = dma.hbm_to_vmem [thread:$0]  (!%p3732_p7), %s3208_s23, 128, %s566_s3, %s3733_s22  }
 0x174   : > { %s602_s9 = sshll.u32 %s595_s27, 4  ;;  %p3736_p5 = scmp.ne.s32.totalorder %s3718_s19, 0  ;;  %s3237_s9 = int_to_ptr.vmem [resolvable:$true] %s602_s9 }
 0x178   : > { %s3735_s12 = smov %s3734_s26  ;;  %s3234_s16 = scalar_lea.hbm %s3734_s26, %s3068_s29 }
 0x179   : > { %s2352_s6 = scalar_lea.hbm %s3234_s16, 256  ;;  %s2357_s3 = scalar_lea.hbm %s3735_s12, 512 }
 0x17a   : > { %p2353_p9 = scmp.ne.s32.totalorder %s3234_s16, %s2352_s6  ;;  %p2358_p12 = scmp.lt.u32.totalorder %s3234_s16, %s3735_s12 }
 0x17b   : > { %p2359_p1 = scmp.lt.u32.totalorder %s2357_s3, %s2352_s6  ;;  %p2361_p8 = scmp.lt.u32.totalorder %s2352_s6, %s3234_s16 }
 0x17c   : > { %p2355_p11 = pnand %p2353_p9, %p3736_p5 }
 0x17d   : > { %p2360_p3 = por %p2359_p1, %p2358_p12 }
 0x17e   : > { %p2356_p10 = pneg %p2355_p11 }
 0x17f   : > { %p2362_p2 = por %p2361_p8, %p2360_p3 }
 0x181   : > { %p2363_p0 = pnand %p2362_p2, %p2356_p10 }
 0x183   : > { %2366 = shalt.err (!%p2363_p0)
}
 0x184   : > { %s2367_s30 = scalar_lea.vmem %s3237_s9, 256  ;;  %s2666_s4 = smov [#allocation10]  }
 0x185   : > { %p2368_p13 = scmp.ne.s32.totalorder %s3237_s9, %s2367_s30  ;;  %s2372_s22 = sshll.u32 %s2666_s4, 4  ;;  %s2373_s22 = int_to_ptr.vmem [resolvable:$false] %s2372_s22 }
 0x186   : > { %s2374_s7 = scalar_lea.vmem %s2373_s22, 512  ;;  %p2375_p7 = scmp.lt.s32.totalorder %s3237_s9, %s2373_s22 }
 0x187   : > { %p2370_p4 = pnand %p2368_p13, %p3736_p5  ;;  %p2376_p9 = scmp.lt.s32.totalorder %s2374_s7, %s2367_s30 }
 0x189   : > { %p2371_p6 = pneg %p2370_p4  ;;  %p2377_p11 = por %p2376_p9, %p2375_p7 }
 0x18b   : > { %p2378_p12 = pnand %p2377_p11, %p2371_p6 }
 0x18d   : > { %2381 = shalt.err (!%p2378_p12)
}
 0x18e   : > { %p3737_p10 = scmp.ne.s32.totalorder %s3701_s28, 0  ;;  %s3738_s25 = scalar_lea.sflag [#allocation9], %s2985_s14 }
 0x18f   : > { %s3739_s6 = sld [smem:[#allocation66_spill]]  ;;  %s637_s23 = scalar_lea.vmem [#allocation13], %s3065_s2 }
 0x190   : > { %1895 = dma.hbm_to_vmem [thread:$0]  (!%p3737_p10), %s3234_s16, 256, %s3237_s9, %s3738_s25, %s3720_s0, %s3720_s0, %s3719_s20  }
 0x191   : > { %s644_s3 = sshll.u32 %s637_s23, 4  ;;  %s3740_s5 = sand.u32 1, %s2620_s18   ;;  %s3272_s3 = int_to_ptr.vmem [resolvable:$true] %s644_s3 }
 0x192   : > { %s3276_s24 = sshll.u32 %s3740_s5, 3 }
 0x195   : > { %s3269_s17 = scalar_lea.hbm %s3739_s6, %s3068_s29  ;;  %s2387_s29 = scalar_lea.hbm %s3739_s6, 512 }
 0x196   : > { %s2382_s30 = scalar_lea.hbm %s3269_s17, 256  ;;  %p2388_p2 = scmp.lt.u32.totalorder %s3269_s17, %s3739_s6 }
 0x197   : > { %p2383_p1 = scmp.ne.s32.totalorder %s3269_s17, %s2382_s30  ;;  %p2389_p0 = scmp.lt.u32.totalorder %s2387_s29, %s2382_s30 }
 0x198   : > { %p2391_p4 = scmp.lt.u32.totalorder %s2382_s30, %s3269_s17 }
 0x199   : > { %p2385_p3 = pnand %p2383_p1, %p3736_p5  ;;  %p2390_p13 = por %p2389_p0, %p2388_p2 }
 0x19b   : > { %p2386_p8 = pneg %p2385_p3  ;;  %p2392_p6 = por %p2391_p4, %p2390_p13 }
 0x19d   : > { %p2393_p7 = pnand %p2392_p6, %p2386_p8 }
 0x19f   : > { %2396 = shalt.err (!%p2393_p7)
}
 0x1a0   : > { %s2397_s2 = scalar_lea.vmem %s3272_s3, 256  ;;  %s2667_s7 = smov [#allocation13]  }
 0x1a1   : > { %p2398_p9 = scmp.ne.s32.totalorder %s3272_s3, %s2397_s2  ;;  %s2402_s25 = sshll.u32 %s2667_s7, 4  ;;  %s2403_s25 = int_to_ptr.vmem [resolvable:$false] %s2402_s25 }
 0x1a2   : > { %s2404_s26 = scalar_lea.vmem %s2403_s25, 512  ;;  %p2405_p1 = scmp.lt.s32.totalorder %s3272_s3, %s2403_s25 }
 0x1a3   : > { %p2400_p11 = pnand %p2398_p9, %p3736_p5  ;;  %p2406_p3 = scmp.lt.s32.totalorder %s2404_s26, %s2397_s2 }
 0x1a5   : > { %p2401_p12 = pneg %p2400_p11  ;;  %p2407_p2 = por %p2406_p3, %p2405_p1 }
 0x1a7   : > { %p2408_p0 = pnand %p2407_p2, %p2401_p12 }
 0x1a9   : > { %2411 = shalt.err (!%p2408_p0)
}
 0x1aa   : > { %s3741_s27 = scalar_lea.sflag [#allocation12], %s2985_s14  ;;  %s1755_s23 = sshll.u32 %s3707_s11, 7 }
 0x1ab   : > { %1901 = dma.hbm_to_vmem [thread:$0]  (!%p3737_p10), %s3269_s17, 256, %s3272_s3, %s3741_s27, %s3720_s0, %s3720_s0, %s3719_s20  }
 0x1ac   : > { %s3742_s16 = sld [smem:[#allocation69_spill]]  ;;  %s658_s4 = scalar_lea.vmem [#allocation17], %s3276_s24 }
 0x1ad   : > { %s665_s22 = sshll.u32 %s658_s4, 4  ;;  %s655_s2 = scalar_lea.sflag [#allocation18], %s2985_s14  ;;  %s3311_s22 = int_to_ptr.vmem [resolvable:$true] %s665_s22 }
 0x1b2   : > { %s3743_s9 = smov %s3742_s16  ;;  %s3308_s29 = scalar_lea.hbm %s3742_s16, %s1755_s23 }
 0x1b3   : > { %s2412_s7 = scalar_lea.hbm %s3308_s29, 128  ;;  %s2417_s3 = scalar_lea.hbm %s3743_s9, 256 }
 0x1b4   : > { %p2413_p8 = scmp.ne.s32.totalorder %s3308_s29, %s2412_s7  ;;  %p2418_p6 = scmp.lt.u32.totalorder %s3308_s29, %s3743_s9 }
 0x1b5   : > { %p2419_p7 = scmp.lt.u32.totalorder %s2417_s3, %s2412_s7  ;;  %p2421_p11 = scmp.lt.u32.totalorder %s2412_s7, %s3308_s29 }
 0x1b6   : > { %p2415_p13 = pnand %p2413_p8, %p3736_p5 }
 0x1b7   : > { %p2420_p9 = por %p2419_p7, %p2418_p6 }
 0x1b8   : > { %p2416_p4 = pneg %p2415_p13 }
 0x1b9   : > { %p2422_p12 = por %p2421_p11, %p2420_p9 }
 0x1bb   : > { %p2423_p1 = pnand %p2422_p12, %p2416_p4 }
 0x1bd   : > { %2426 = shalt.err (!%p2423_p1)
}
 0x1be   : > { %s2427_s24 = scalar_lea.vmem %s3311_s22, 128  ;;  %s2668_s27 = smov [#allocation17]  }
 0x1bf   : > { %p2428_p3 = scmp.ne.s32.totalorder %s3311_s22, %s2427_s24  ;;  %s2432_s23 = sshll.u32 %s2668_s27, 4  ;;  %s2433_s23 = int_to_ptr.vmem [resolvable:$false] %s2432_s23 }
 0x1c0   : > { %s2434_s5 = scalar_lea.vmem %s2433_s23, 256  ;;  %p2435_p8 = scmp.lt.s32.totalorder %s3311_s22, %s2433_s23 }
 0x1c1   : > { %p2430_p2 = pnand %p2428_p3, %p3736_p5  ;;  %p2436_p13 = scmp.lt.s32.totalorder %s2434_s5, %s2427_s24 }
 0x1c3   : > { %p2431_p0 = pneg %p2430_p2  ;;  %p2437_p6 = por %p2436_p13, %p2435_p8 }
 0x1c5   : > { %p2438_p7 = pnand %p2437_p6, %p2431_p0 }
 0x1c7   : > { %2441 = shalt.err (!%p2438_p7)
}
 0x1c8   : > { %1904 = dma.hbm_to_vmem [thread:$0]  (!%p3737_p10), %s3308_s29, 128, %s3311_s22, %s655_s2, %s3720_s0, %s3720_s0, %s3719_s20  }
 0x1c9   : > { %s3744_s19 = sld [smem:[#allocation48_spill]] }
 0x1cf   : > { %p3745_p5 = scmp.ne.s32.totalorder %s3744_s19, 0 }
 0x1d0   : > { %s3746_s30 = sld [smem:[#allocation41_spill]] (!%p3745_p5)  ;;  %s3747_s16 = sld [smem:[#allocation49_spill]] (!%p3745_p5) }
 0x1d1   : > { %677 = sbr.rel (%p3745_p5) target bundleno = 2072 (0x818), region = 72 }
 0x1d6   : > { %s3343_s4 = sand.u32 (!%p3745_p5), 1, %s3746_s30   ;;  %p3748_p4 = scmp.ne.s32.totalorder (!%p3745_p5), %s3747_s16, 0 }
 0x1d7   : > { %s3346_s7 = sshll.u32 (!%p3745_p5), %s3343_s4, 3  ;;  %s680_s28 = scalar_lea.sflag (!%p3745_p5), [#allocation3], %s3343_s4 }
 0x1d8   : > { %s683_s11 = scalar_lea.vmem [#allocation2], %s3346_s7 }
 0x1d9   : > { %2555 = dma.done.wait (%p3748_p4), %s680_s28, 128  }
 0x1da   : > { %2557 = vsyncadd (%p3748_p4), %s680_s28, 4294967168  ;;  %s3749_s14 = sld [smem:[#allocation47_spill]]  ;;  %s692_s29 = scalar_lea.vmem [#allocation5], %s3346_s7 }
 0x1e0   : > { %s688_s20 = sand.u32 1, %s3749_s14  }
 0x1e1   : > { %s689_s0 = scalar_lea.sflag [#allocation6], %s688_s20 }
 0x1e2   : > { %2559 = dma.done.wait (%p3748_p4), %s689_s0, 256  }
 0x1e3   : > { %2561 = vsyncadd (%p3748_p4), %s689_s0, 4294967040  ;;  %s701_s22 = scalar_lea.vmem [#allocation7], %s3346_s7  ;;  %s707_s2 = scalar_lea.sflag [#allocation9], %s688_s20 }
 0x1e4   : > { %s710_s17 = scalar_lea.vmem [#allocation8], %s3346_s7 }
 0x1e5   : > { %2563 = dma.done.wait (%p3748_p4), %s707_s2, 128  }
 0x1e6   : > { %2565 = vsyncadd (%p3748_p4), %s707_s2, 4294967168  ;;  %s3750_s3 = sld [smem:[#allocation39_spill]]  ;;  %s3751_s25 = sld [smem:[#allocation50_spill]] }
 0x1ec   : > { %s717_s26 = sand.u32 1, %s3750_s3   ;;  %p3752_p10 = scmp.ne.s32.totalorder %s3751_s25, 0 }
 0x1ed   : > { %s3367_s24 = sshll.u32 %s717_s26, 4 }
 0x1ee   : > { %s719_s27 = scalar_lea.vmem [#allocation10], %s3367_s24 }
 0x1ef   : > { %2567 = dma.done.wait (%p3752_p10), %s707_s2, 256  }
 0x1f0   : > { %2569 = vsyncadd (%p3752_p10), %s707_s2, 4294967040  ;;  %s725_s23 = scalar_lea.sflag [#allocation12], %s688_s20  ;;  %s728_s5 = scalar_lea.vmem [#allocation11], %s3367_s24 }
 0x1f1   : > { %2571 = dma.done.wait (%p3752_p10), %s725_s23, 512  }
 0x1f2   : > { %2573 = vsyncadd (%p3752_p10), %s725_s23, 4294966784  ;;  %s737_s19 = scalar_lea.vmem [#allocation13], %s3367_s24  ;;  %p3753_p9 = scmp.eq.s32.totalorder %s3749_s14, 0 }
 0x1f4   : > { %2575 = dma.done.wait (%p3753_p9), [#allocation15], 32   ;;  %p3754_p11 = pmov %p3753_p9 }
 0x1f5   : > { %s3384_s30 = sshll.u32 %s717_s26, 3  ;;  %s751_s16 = scalar_lea.sflag [#allocation18], %s688_s20 }
 0x1f6   : > { %2577 = vsyncadd (%p3754_p11), [#allocation15], 4294967264  ;;  %s754_s28 = scalar_lea.vmem [#allocation17], %s3384_s30 }
 0x1f7   : > { %2579 = dma.done.wait (%p3752_p10), %s751_s16, 128  }
 0x1f8   : > { %2581 = vsyncadd (%p3752_p10), %s751_s16, 4294967168  ;;  %p3755_p12 = pmov %p3753_p9 }
 0x1f9   : > { %p3756_p1 = pmov %p3753_p9 }
 0x1fa   : > { %2583 = dma.done.wait (%p3755_p12), [#allocation18], 16  }
 0x1fb   : > { %2585 = vsyncadd (%p3756_p1), [#allocation18], 4294967280  ;;  %p3757_p3 = pmov %p3756_p1 }
 0x1fc   : > { %p3758_p2 = pmov %p3756_p1 }
 0x1fd   : > { %2587 = dma.done.wait (%p3757_p3), [#allocation21], 272  }
 0x1fe   : > { %2589 = vsyncadd (%p3758_p2), [#allocation21], 4294967024  ;;  %vm854_vm0 = vcmask 261120   ;;  %v3401_v0 = vld [vmem:[%s683_s11] sm:$0xff]  ;;  %v2669_v8 = vmov 0.0   ;;  %v2048_v9 = vld [vmem:[%s728_s5 + $0x8] sm:$0xff]  }
 0x1ff   : > { %v855_v1 = vsel %vm854_vm0, %v3401_v0, 0.0  ;;  %v2047_v7 = vld [vmem:[%s728_s5] sm:$0xff]   ;;  %1782 = vmatprep.subr.bf16.mxu1 %v2669_v8  ;;  %1774 = vmatprep.subr.bf16.mxu0 %v2669_v8  ;;  %v886_v10 = vld [vmem:[%s692_s29] sm:$0xff]  ;;  %vm2670_vm1 = vmmov 0   ;;  %vm1070_vm2 = vcmask 130048   ;;  %vm1119_vm4 = vcmask 64512  }
 0x200   : > { %856 = vadd.xlane.f32.xlu0 %v855_v1  ;;  %1783 = vmatpush3.bf16.msra.mxu1 %v2047_v7  ;;  %v887_v11 = vpack.c.bf16 %v886_v10, %v886_v10  ;;  %v2049_v12 = vld [vmem:[%s719_s27] sm:$0xff]   ;;  %v2050_v13 = vld [vmem:[%s719_s27 + $0x8] sm:$0xff]   ;;  %s3759_s11 = sld [smem:[#allocation38_spill]]  ;;  %vm1136_vm5 = vcmask 1043456   ;;  %s3452_s29 = scalar_lea.vmem [#allocation23], %s3346_s7 }
 0x201   : > { %1784 = vmatprep.subr.bf16.mxu1 %v2669_v8  ;;  %1786 = vmatprep.mubr.msk.bf16.mxu1 %vm2670_vm1, %v2669_v8  ;;  %v1723_v18 = vld [vmem:[#allocation14] ss:$0 sm:$0xff]  ;;  %v1724_v20 = vld [vmem:[#allocation16] ss:$0 sm:$0xff]  ;;  %v2052_v36 = vld [vmem:[%s737_s19 + $0x8] sm:$0xff]  }
 0x202   : > { %1778 = vmatprep.mubr.msk.bf16.mxu0 %vm2670_vm1, %v2669_v8  ;;  %1775 = vmatpush3.bf16.msra.mxu0 %v2049_v12  ;;  %v2051_v35 = vld [vmem:[%s737_s19] sm:$0xff]   ;;  %v853_v39 = vld [vmem:[%s710_s17] sm:$0xff] }
 0x203   : > { %1776 = vmatprep.subr.bf16.mxu0 %v2669_v8  ;;  %v888_v37 = vld [vmem:[%s701_s22] sm:$0xff]  ;;  %vm1117_vm3 = vcmp.ne.s32.totalorder %v853_v39, 0  ;;  %s3760_s22 = sld [smem:[#allocation42_spill]] }
 0x204   : > { %1785 = vmatpush3.bf16.msra.mxu1 %v2048_v9  ;;  %v889_v38 = vpack.c.bf16 %v888_v37, %v888_v37  ;;  %v2053_v57 = vld [vmem:[%s754_s28] sm:$0xff]  }
 0x205   : > { %1798 = vmatprep.subr.bf16.mxu1 %v2669_v8 }
 0x206   : > { %1777 = vmatpush3.bf16.msra.mxu0 %v2050_v13  ;;  %s848_s14 = sand.u32 1, %s3759_s11  }
 0x207   : > { %1787 = vmatmul.mubr.msk.bf16.vlgmr.msra.gmra.mrb[0].mxu1 %vm854_vm0, %v887_v11  ;;  %1790 = vmatprep.subr.bf16.mxu0 %v2669_v8  ;;  %s3443_s20 = sshll.u32 %s848_s14, 3 }
 0x208   : > { %1800 = vmatprep.mubr.msk.bf16.mxu1 %vm2670_vm1, %v2669_v8  ;;  %s850_s0 = scalar_lea.vmem [#allocation24], %s3443_s20 }
 0x209   : > { %p1738_p0 = scmp.ne.s32.totalorder %s3760_s22, 0 }
 0x20a   : > { %v2671_v9 = vmov (!%p1738_p0), 0.0   ;;  %v2061_v10 = vld [vmem:[#allocation20 + $0x8] sm:$0xff] (!%p1738_p0)   ;;  %vm2672_vm6 = vmmov (!%p1738_p0), 0   ;;  %v1236_v11 = vpack.c.bf16 (!%p1738_p0), %v3401_v0, %v3401_v0  ;;  %v1742_v13 = vld [vmem:[#allocation19] ss:$0 sm:$0xff] (!%p1738_p0) }
 0x28d   : > { %v857_v2 = vpop.xlane.xlu0 %856 }
 0x28e   : > { %v859_v3 = vmul.f32 0.03125, %v857_v2 }
 0x290   : > { %v860_v4 = vsub.f32 %v3401_v0, %v859_v3 }
 0x292   : > { %v861_v5 = vmul.f32 %v860_v4, %v860_v4 }
 0x294   : > { %v862_v6 = vsel %vm854_vm0, %v861_v5, 0.0 }
 0x295   : > { %863 = vadd.xlane.f32.xlu0 %v862_v6 }
 0x2da   : > { %v1003_v24 = vpop.f32.mrb[0].mxu1 }
 0x2db   : > { %v1009_v25 = vpack.c.bf16 %v1003_v24, %v1003_v24  ;;  %v1788_v26 = vpop.f32.mrb[1].mxu1 }
 0x2dc   : > { %v1006_v27 = vpop.f32.mrb[2].mxu1 }
 0x2dd   : > { %v1075_v28 = vsel %vm1070_vm2, %v1009_v25, 0  ;;  %v1789_v29 = vpop.f32.mrb[3].mxu1 }
 0x2de   : > { %1799 = vmatpush3.bf16.xpose.msra.mxu1 %v1075_v28 }
 0x2df   : > { %1810 = vmatprep.subr.bf16.mxu1 %v2669_v8 }
 0x322   : > { %v864_v14 = vpop.xlane.xlu0 %863 }
 0x323   : > { %v865_v15 = vmul.f32 0.03125, %v864_v14 }
 0x325   : > { %v866_v16 = vadd.f32 1e-05, %v865_v15 }
 0x327   : > { %2054 = vrsqrt.f32 %v866_v16  ;;  %v1743_v16 = vld [vmem:[#allocation22] ss:$0 sm:$0xff] (!%p1738_p0) }
 0x331   : > { %v2055_v17 = vpop.eup %2054 }
 0x332   : > { %v868_v19 = vmul.f32 %v2055_v17, %v860_v4 }
 0x334   : > { %v876_v21 = vmul.f32 %v1723_v18, %v868_v19 }
 0x336   : > { %v884_v22 = vadd.f32 %v1724_v20, %v876_v21 }
 0x338   : > { %v885_v23 = vpack.c.bf16 %v884_v22, %v884_v22 }
 0x33a   : > { %1779 = vmatmul.mubr.msk.bf16.vlgmr.msra.gmra.mrb[0].mxu0 %vm854_vm0, %v885_v23 }
 0x33b   : > { %1794 = vmatprep.mubr.msk.bf16.mxu0 %vm2670_vm1, %v2669_v8  ;;  %1791 = vmatpush3.bf16.msra.mxu0 %v2051_v35 }
 0x33c   : > { %1792 = vmatprep.subr.bf16.mxu0 %v2669_v8 }
 0x33f   : > { %1793 = vmatpush3.bf16.msra.mxu0 %v2052_v36 }
 0x340   : > { %1804 = vmatprep.subr.bf16.mxu0 %v2669_v8 }
 0x342   : > { %1795 = vmatmul.mubr.msk.bf16.vlgmr.msra.gmra.mrb[4].mxu0 %vm854_vm0, %v889_v38 }
 0x343   : > { %1806 = vmatprep.mubr.msk.bf16.mxu0 %vm2670_vm1, %v2669_v8 }
 0x40d   : > { %v943_v30 = vpop.f32.mrb[0].mxu0 }
 0x40e   : > { %v949_v31 = vpack.c.bf16 %v943_v30, %v943_v30  ;;  %v1780_v32 = vpop.f32.mrb[1].mxu0 }
 0x40f   : > { %v946_v33 = vpop.f32.mrb[2].mxu0 }
 0x410   : > { %v1781_v34 = vpop.f32.mrb[3].mxu0  ;;  %1801 = vmatmul.mubr.msk.bf16.vlgmr.msra.gmra.mrb[4].mxu1 %vm1070_vm2, %v949_v31 }
 0x411   : > { %1812 = vmatprep.mubr.msk.bf16.mxu1 %vm2670_vm1, %v2669_v8  ;;  %1811 = vmatpush3.bf16.msra.mxu1 %v2053_v57  ;;  %v2060_v8 = vld [vmem:[#allocation20] sm:$0xff] (!%p1738_p0)  }
 0x415   : > { %v1063_v51 = vpop.f32.mrb[4].mxu0 }
 0x416   : > { %v1796_v52 = vpop.f32.mrb[5].mxu0  ;;  %v1069_v55 = vpack.c.bf16 %v1063_v51, %v1063_v51 }
 0x417   : > { %v1066_v53 = vpop.f32.mrb[6].mxu0 }
 0x418   : > { %v1797_v54 = vpop.f32.mrb[7].mxu0  ;;  %v1138_v56 = vsel %vm1136_vm5, %v1069_v55, 0 }
 0x419   : > { %1805 = vmatpush3.bf16.msra.mxu0 %v1138_v56 }
 0x41a   : > { %1816 = vmatprep.subr.bf16.mxu0 (!%p1738_p0), %v2671_v9 }
 0x4e3   : > { %v1111_v40 = vpop.f32.mrb[4].mxu1 }
 0x4e4   : > { %v1118_v41 = vsel %vm1117_vm3, -1e+30, %v1111_v40  ;;  %v1802_v42 = vpop.f32.mrb[5].mxu1 }
 0x4e5   : > { %v1114_v43 = vpop.f32.mrb[6].mxu1  ;;  %v1120_v44 = vsel %vm1119_vm4, %v1118_v41, -inf }
 0x4e6   : > { %1121 = vmax.xlane.f32.xlu1 %v1120_v44  ;;  %v1803_v45 = vpop.f32.mrb[7].mxu1 }
 0x573   : > { %v1122_v46 = vpop.xlane.xlu1 %1121 }
 0x574   : > { %v1123_v47 = vsub.f32 %v1118_v41, %v1122_v46 }
 0x576   : > { %v1124_v48 = vmul.f32 1.442695, %v1123_v47 }
 0x578   : > { %2056 = vpow2.f32 %v1124_v48 }
 0x582   : > { %v2057_v49 = vpop.eup %2056 }
 0x583   : > { %v1126_v50 = vsel %vm1119_vm4, %v2057_v49, 0.0 }
 0x584   : > { %1127 = vadd.xlane.f32.xlu1 %v1126_v50 }
 0x611   : > { %v1128_v58 = vpop.xlane.xlu1 %1127 }
 0x612   : > { %2058 = vrcp.f32 %v1128_v58 }
 0x61c   : > { %v2059_v59 = vpop.eup %2058 }
 0x61d   : > { %v1130_v60 = vmul.f32 %v2059_v59, %v2057_v49 }
 0x61f   : > { %1131 = vst.msk [vmem:[%s850_s0] sm:$0xff] %vm1119_vm4, %v1130_v60  ;;  %v1132_v61 = vpack.c.bf16 %v1130_v60, %v1130_v60 }
 0x621   : > { %1807 = vmatmul.mubr.msk.bf16.vlgmr.msra.gmra.mrb[8].mxu0 %vm1119_vm4, %v1132_v61 }
 0x622   : > { %1817 = vmatpush3.bf16.msra.mxu0 (!%p1738_p0), %v2060_v8  ;;  %1820 = vmatprep.mubr.msk.bf16.mxu0 (!%p1738_p0), %vm2672_vm6, %v2671_v9 }
 0x623   : > { %1818 = vmatprep.subr.bf16.mxu0 (!%p1738_p0), %v2671_v9 }
 0x626   : > { %1819 = vmatpush3.bf16.msra.mxu0 (!%p1738_p0), %v2061_v10 }
 0x629   : > { %1821 = vmatmul.mubr.msk.bf16.vlgmr.msra.gmra.mrb[0].mxu0 (!%p1738_p0), %vm854_vm0, %v1236_v11 }
 0x6f4   : > { %v1174_v62 = vpop.f32.mrb[8].mxu0 }
 0x6f5   : > { %v1180_v63 = vpack.c.bf16 %v1174_v62, %v1174_v62  ;;  %v1808_v1 = vpop.f32.mrb[9].mxu0 }
 0x6f6   : > { %v1177_v2 = vpop.f32.mrb[10].mxu0 }
 0x6f7   : > { %v1809_v3 = vpop.f32.mrb[11].mxu0  ;;  %1813 = vmatmul.mubr.msk.bf16.vlgmr.msra.gmra.mrb[8].mxu1 %vm1070_vm2, %v1180_v63 }
 0x6fc   : > { %v1290_v12 = vpop.f32.mrb[0].mxu0 (!%p1738_p0) }
 0x6fd   : > { %v1822_v15 = vpop.f32.mrb[1].mxu0 (!%p1738_p0) }
 0x6fe   : > { %v1293_v17 = vpop.f32.mrb[2].mxu0 (!%p1738_p0) }
 0x6ff   : > { %v1823_v19 = vpop.f32.mrb[3].mxu0 (!%p1738_p0) }
 0x7c7   : > { %1235 = sbr.rel (%p1738_p0) target bundleno = 2002 (0x7d2), region = 128 }
 0x7ca   : > { %v1226_v4 = vpop.f32.mrb[8].mxu1 }
 0x7cb   : > { %v1814_v5 = vpop.f32.mrb[9].mxu1  ;;  %v1296_v14 = vadd.f32 (!%p1738_p0), %v1290_v12, %v1226_v4 }
 0x7cc   : > { %v1229_v6 = vpop.f32.mrb[10].mxu1 }
 0x7cd   : > { %v1815_v7 = vpop.f32.mrb[11].mxu1  ;;  %v1304_v18 = vadd.f32 (!%p1738_p0), %v1742_v13, %v1296_v14 }
 0x7cf   : > { %v1312_v20 = vadd.f32 %v1743_v16, %v1304_v18 }
 0x7d1   : > { %1313 = vst.msk [vmem:[%s3452_s29] sm:$0xff] %vm854_vm0, %v1312_v20 }
 0x7d2 PF: > { %s3761_s7 = sld [smem:[#allocation42_spill]] }
 0x7d8   : > { %p1744_p8 = scmp.le.s32.totalorder %s3761_s7, 0 }
 0x7d9   : > { %v1318_v0 = vld [vmem:[%s3452_s29] sm:$0xff] (!%p1744_p8) }
 0x7da   : > { %1317 = sbr.rel (%p1744_p8) target bundleno = 2017 (0x7e1), region = 132  ;;  %v1319_v21 = vadd.f32 (!%p1744_p8), %v1318_v0, %v1226_v4 }
 0x7dc   : > { %1320 = vst.msk [vmem:[%s3452_s29] sm:$0xff] (!%p1744_p8), %vm854_vm0, %v1319_v21 }
 0x7e1 PF: > { %s3762_s2 = sld [smem:[#allocation43_spill]]  ;;  %s3763_s17 = sld [smem:[#allocation51_spill]] }
 0x7e2   : > { %s3764_s24 = sld [smem:[#allocation73_spill]]  ;;  %s1341_s5 = sshll.u32 %s3452_s29, 4  ;;  %s1342_s5 = int_to_ptr.vmem [resolvable:$true] %s1341_s5 }
 0x7e3   : > { %s1322_s19 = scalar_lea.sflag [#allocation4], %s3343_s4  ;;  %s2442_s30 = scalar_lea.vmem %s1342_s5, 128 }
 0x7e4   : > { %p2443_p13 = scmp.ne.s32.totalorder %s1342_s5, %s2442_s30  ;;  %s2673_s16 = smov [#allocation23]  }
 0x7e5   : > { %s2446_s28 = sshll.u32 %s2673_s16, 4  ;;  %s2447_s28 = int_to_ptr.vmem [resolvable:$false] %s2446_s28 }
 0x7e6   : > { %s2448_s11 = scalar_lea.vmem %s2447_s28, 256  ;;  %p2449_p4 = scmp.lt.s32.totalorder %s1342_s5, %s2447_s28 }
 0x7e7   : > { %s1747_s3 = sshll.u32 %s3762_s2, 7  ;;  %p3766_p6 = scmp.ne.s32.totalorder %s3763_s17, 0 }
 0x7e8   : > { %s3765_s27 = smov %s3764_s24  ;;  %s3468_s23 = scalar_lea.hbm %s3764_s24, %s1747_s3 }
 0x7e9   : > { %p2444_p7 = pnand %p2443_p13, %p3766_p6  ;;  %p2450_p10 = scmp.lt.s32.totalorder %s2448_s11, %s2442_s30 }
 0x7eb   : > { %p2445_p5 = pneg %p2444_p7  ;;  %p2451_p9 = por %p2450_p10, %p2449_p4 }
 0x7ed   : > { %p2452_p11 = pnand %p2451_p9, %p2445_p5 }
 0x7ef   : > { %2455 = shalt.err (!%p2452_p11)
}
 0x7f0   : > { %s2456_s4 = scalar_lea.hbm %s3468_s23, 128  ;;  %s2460_s7 = scalar_lea.hbm %s3765_s27, 256 }
 0x7f1   : > { %p2457_p12 = scmp.ne.s32.totalorder %s3468_s23, %s2456_s4  ;;  %p2461_p2 = scmp.lt.u32.totalorder %s3468_s23, %s3765_s27 }
 0x7f2   : > { %p2462_p0 = scmp.lt.u32.totalorder %s2460_s7, %s2456_s4  ;;  %p2464_p13 = scmp.lt.u32.totalorder %s2456_s4, %s3468_s23 }
 0x7f3   : > { %p2458_p1 = pnand %p2457_p12, %p3766_p6 }
 0x7f4   : > { %p2463_p8 = por %p2462_p0, %p2461_p2 }
 0x7f5   : > { %p2459_p3 = pneg %p2458_p1 }
 0x7f6   : > { %p2465_p7 = por %p2464_p13, %p2463_p8 }
 0x7f8   : > { %p2466_p5 = pnand %p2465_p7, %p2459_p3 }
 0x7fa   : > { %2469 = shalt.err (!%p2466_p5)
}
 0x7fb   : > { %s3767_s26 = sld [smem:[#allocation42_spill]]  ;;  %s3769_s30 = sld [smem:[#allocation53_spill]] }
 0x7fc   : > { %1860 = dma.vmem_to_hbm [thread:$0]  (%p3766_p6), %s1342_s5, 128, %s3468_s23, %s1322_s19  }
 0x7fd   : > { %s1357_s28 = sshll.u32 %s850_s0, 4  ;;  %s3770_s17 = sld [smem:[#allocation74_spill]]  ;;  %s3493_s28 = int_to_ptr.vmem [resolvable:$true] %s1357_s28 }
 0x7fe   : > { %s1327_s25 = scalar_lea.sflag [#allocation25], %s848_s14  ;;  %s2470_s1 = scalar_lea.vmem %s3493_s28, 128 }
 0x7ff   : > { %p2471_p4 = scmp.ne.s32.totalorder %s3493_s28, %s2470_s1  ;;  %s2674_s20 = smov [#allocation24]  }
 0x800   : > { %s2474_s0 = sshll.u32 %s2674_s20, 4  ;;  %s2475_s0 = int_to_ptr.vmem [resolvable:$false] %s2474_s0 }
 0x801   : > { %s1748_s16 = sshll.u32 %s3767_s26, 1  ;;  %p3772_p10 = scmp.ne.s32.totalorder %s3769_s30, 0 }
 0x802   : > { %s1353_s11 = sadd.s32 %s3762_s2, %s1748_s16  ;;  %s2476_s2 = scalar_lea.vmem %s2475_s0, 256 }
 0x803   : > { %s1749_s4 = sshll.u32 %s1353_s11, 7  ;;  %s3771_s7 = smov %s3770_s17 }
 0x804   : > { %s1355_s3 = scalar_lea.hbm %s3770_s17, %s1749_s4  ;;  %p2472_p6 = pnand %p2471_p4, %p3772_p10 }
 0x805   : > { %p2477_p11 = scmp.lt.s32.totalorder %s3493_s28, %s2475_s0  ;;  %p2478_p12 = scmp.lt.s32.totalorder %s2476_s2, %s2470_s1 }
 0x806   : > { %p2473_p9 = pneg %p2472_p6 }
 0x807   : > { %p2479_p1 = por %p2478_p12, %p2477_p11 }
 0x809   : > { %p2480_p3 = pnand %p2479_p1, %p2473_p9 }
 0x80b   : > { %2483 = shalt.err (!%p2480_p3)
}
 0x80c   : > { %s2484_s23 = scalar_lea.hbm %s1355_s3, 128  ;;  %s2488_s19 = scalar_lea.hbm %s3771_s7, 512 }
 0x80d   : > { %p2485_p2 = scmp.ne.s32.totalorder %s1355_s3, %s2484_s23  ;;  %p2489_p13 = scmp.lt.u32.totalorder %s1355_s3, %s3771_s7 }
 0x80e   : > { %p2490_p7 = scmp.lt.u32.totalorder %s2488_s19, %s2484_s23  ;;  %p2492_p4 = scmp.lt.u32.totalorder %s2484_s23, %s1355_s3 }
 0x80f   : > { %p2486_p0 = pnand %p2485_p2, %p3772_p10 }
 0x810   : > { %p2491_p5 = por %p2490_p7, %p2489_p13 }
 0x811   : > { %p2487_p8 = pneg %p2486_p0 }
 0x812   : > { %p2493_p6 = por %p2492_p4, %p2491_p5 }
 0x814   : > { %p2494_p9 = pnand %p2493_p6, %p2487_p8 }
 0x816   : > { %2497 = shalt.err (!%p2494_p9)
}
 0x817   : > { %1861 = dma.vmem_to_hbm [thread:$0]  (%p3772_p10), %s3493_s28, 128, %s1355_s3, %s1327_s25  }
 0x818 PF: > { %s3773_s1 = sld [smem:[#allocation46_spill]]  ;;  %s3774_s16 = sld [smem:[#allocation40_spill]] }
 0x819   : > { %s3775_s11 = sld [smem:[#allocation52_spill]] }
 0x81e   : > { %p1923_p11 = scmp.ge.s32.totalorder %s3773_s1, 2  ;;  %s1369_s4 = sand.u32 1, %s3774_s16  }
 0x81f   : > { %p3776_p12 = scmp.ne.s32.totalorder %s3775_s11, 0  ;;  %s1370_s29 = scalar_lea.sflag [#allocation4], %s1369_s4 }
 0x821   : > { %p1906_p1 = pnand %p1923_p11, %p3776_p12 }
 0x823   : > { %2591 = dma.done.wait (!%p1906_p1), %s1370_s29, 128  }
 0x824   : > { %2593 = vsyncadd (!%p1906_p1), %s1370_s29, 4294967168  ;;  %s3777_s22 = sld [smem:[#allocation37_spill]]  ;;  %s3778_s17 = sld [smem:[#allocation54_spill]] }
 0x82a   : > { %s1378_s20 = sand.u32 1, %s3777_s22   ;;  %p3779_p3 = scmp.ne.s32.totalorder %s3778_s17, 0 }
 0x82b   : > { %s1379_s0 = scalar_lea.sflag [#allocation25], %s1378_s20 }
 0x82c   : > { %p1909_p2 = pnand %p1923_p11, %p3779_p3 }
 0x82e   : > { %2595 = dma.done.wait (!%p1909_p2), %s1379_s0, 128  }
 0x82f   : > { %2597 = vsyncadd (!%p1909_p2), %s1379_s0, 4294967168  ;;  %s48_s26 = sadd.s32 1, %s3773_s1   ;;  %s3781_s29 = sld [smem:[#allocation38_spill]] }
 0x830   : > { %p3524_p10 = scmp.ge.s32.totalorder %s48_s26, 6   ;;  %s3782_s28 = sld [smem:[#allocation59_spill]] }
 0x831   : > { %s3783_s16 = sld [smem:[#allocation39_spill]]  ;;  %s3784_s3 = sld [smem:[#allocation57_spill]] }
 0x832   : > { %s3785_s19 = sld [smem:[#allocation41_spill]]  ;;  %s3786_s25 = sld [smem:[#allocation58_spill]] }
 0x833   : > { %s3787_s22 = sld [smem:[#allocation44_spill]]  ;;  %s3788_s23 = sld [smem:[#allocation45_spill]] }
 0x834   : > { %s3789_s24 = sld [smem:[#allocation55_spill]]  ;;  %s3790_s2 = sld [smem:[#allocation56_spill]] }
 0x835   : > { %s3792_s30 = smov %s2608_s15  ;;  %s3794_s17 = smov %s2620_s18 }
 0x836   : > { %s3793_s15 = smov %s3782_s28  ;;  %s3796_s20 = smov %s2632_s21 }
 0x837   : > { %s3795_s18 = smov %s3784_s3  ;;  %47 = sbr.rel (!%p3524_p10) target bundleno = 38 (0x26), region = 247 }
 0x838   : > { %s3797_s21 = smov %s3786_s25 }
 0x83a   : > { %s3798_s25 = smov %s3790_s2 }
 0x83e   :  { %1384 = vsyncpa [#allocation3], 1 }
 0x83f   :  { %1386 = vsyncpa [#allocation3 + $0x1], 1 }
 0x840   :  { %1387 = vsyncpa [#allocation6], 1 }
 0x841   :  { %1389 = vsyncpa [#allocation6 + $0x1], 1 }
 0x842   :  { %1390 = vsyncpa [#allocation9], 1 }
 0x843   :  { %1392 = vsyncpa [#allocation9 + $0x1], 1 }
 0x844   :  { %1393 = vsyncpa [#allocation12], 1 }
 0x845   :  { %1395 = vsyncpa [#allocation12 + $0x1], 1 }
 0x846   :  { %1396 = vsyncpa [#allocation15], 1 }
 0x847   :  { %1397 = vsyncpa [#allocation18], 1 }
 0x848   :  { %1399 = vsyncpa [#allocation18 + $0x1], 1 }
 0x849   :  { %1400 = vsyncpa [#allocation21], 1 }
 0x84a   :  { %1401 = vsyncpa [#allocation4], 1 }
 0x84b   :  { %1403 = vsyncpa [#allocation4 + $0x1], 1 }
 0x84c   :  { %1404 = vsyncpa [#allocation25], 1 }
 0x84d   :  { %1406 = vsyncpa [#allocation25 + $0x1], 1 }

</bundles_post_ra>
